<compile_context>
chip_gen: v6e
topology: v6e:2x2x1
jax: 0.10.0
libtpu: 0.0.40
codegen_flags: <defaults>
</compile_context>

<pallas_src>
import functools

import jax
import jax.numpy as jnp
from jax.experimental import pallas as pl
from jax.experimental.pallas import tpu as pltpu

EPS = 1e-5  # nn.BatchNorm2d default eps


# ----------------------------------------------------------------------------
# Fused layer kernel:  [BN(prev)+ReLU] -> conv (1x1 / (3,1) / (1,3)) -> stats
# ----------------------------------------------------------------------------
def _make_layer_kernel(pre_act, three_tap, fuse_k, step, L):
    def kernel(*refs):
        it = iter(refs)
        x_ref = next(it)
        w_ref = next(it)
        if pre_act:
            sc_ref = next(it)
            sh_ref = next(it)
        if three_tap:
            mm_ref = next(it)
            mp_ref = next(it)
        y_ref = next(it)
        sum_ref = next(it)
        sq_ref = next(it)

        x = x_ref[...].astype(jnp.float32)                        # (Cin, L)
        if pre_act:
            # Previous layer's BN (precomputed scale/shift) + ReLU, fused here.
            x = jnp.maximum(x * sc_ref[...] + sh_ref[...], 0.0)

        if three_tap:
            # Circular roll (XLU) + hoisted 0/1 boundary masks; the masks also
            # kill cross-image leakage at image boundaries inside the block.
            x_m = pltpu.roll(x, shift=step, axis=1) * mm_ref[...]
            x_p = pltpu.roll(x, shift=L - step, axis=1) * mp_ref[...]
            if fuse_k:
                # One K=3*Cin matmul (real LPRNet channel counts).
                xs = jnp.concatenate([x_m, x, x_p], axis=0).astype(jnp.bfloat16)
                y = jnp.dot(w_ref[...], xs, preferred_element_type=jnp.float32)
            else:
                y = jnp.dot(w_ref[0], x_m.astype(jnp.bfloat16),
                            preferred_element_type=jnp.float32)
                y = y + jnp.dot(w_ref[1], x.astype(jnp.bfloat16),
                                preferred_element_type=jnp.float32)
                y = y + jnp.dot(w_ref[2], x_p.astype(jnp.bfloat16),
                                preferred_element_type=jnp.float32)
        else:
            y = jnp.dot(w_ref[...], x.astype(jnp.bfloat16),
                        preferred_element_type=jnp.float32)

        y_ref[...] = y.astype(y_ref.dtype)                        # lane-dense store
        # Per-step partial stats (reduced across blocks in plain JAX); computed
        # from the f32 result before the bf16 cast.
        sum_ref[0] = jnp.sum(y, axis=1, keepdims=True)
        sq_ref[0] = jnp.sum(y * y, axis=1, keepdims=True)

    return kernel


def _compiler_params(block_bytes):
    # Explicit VMEM sizing: double-buffered blocks + headroom, kept well under
    # v7x's 64 MiB physical VMEM (v5e/v6e have 128 MiB, so this is safe there).
    need = 2 * block_bytes + (4 << 20)
    limit = int(min(48 << 20, max(32 << 20, need)))
    return pltpu.CompilerParams(dimension_semantics=("parallel",),
                                vmem_limit_bytes=limit)


def fused_layer(x_cl, w, *, bt, hw, pre_act=False, scale_prev=None,
                shift_prev=None, three_tap=False, fuse_k=False, step=None,
                masks=None, y_dtype=jnp.bfloat16):
    """One SmallBlock layer on (C, N*HW) activations.

    Returns (pre-BN conv output [y_dtype], per-block channel sum, sumsq)."""
    C_in, total_L = x_cl.shape
    C_out = w.shape[0] if w.ndim == 2 else w.shape[1]
    L = bt * hw
    n_blocks = total_L // L

    kernel = _make_layer_kernel(pre_act, three_tap, fuse_k, step, L)

    w_zero = (0,) * w.ndim
    in_specs = [pl.BlockSpec((C_in, L), lambda n: (0, n)),
                pl.BlockSpec(w.shape, lambda n: w_zero)]
    operands = [x_cl, w]
    if pre_act:
        in_specs += [pl.BlockSpec((C_in, 1), lambda n: (0, 0)),
                     pl.BlockSpec((C_in, 1), lambda n: (0, 0))]
        operands += [scale_prev, shift_prev]
    if three_tap:
        in_specs += [pl.BlockSpec((1, L), lambda n: (0, 0)),
                     pl.BlockSpec((1, L), lambda n: (0, 0))]
        operands += list(masks)

    out_shape = (jax.ShapeDtypeStruct((C_out, total_L), y_dtype),
                 jax.ShapeDtypeStruct((n_blocks, C_out, 1), jnp.float32),
                 jax.ShapeDtypeStruct((n_blocks, C_out, 1), jnp.float32))
    out_specs = (pl.BlockSpec((C_out, L), lambda n: (0, n)),
                 pl.BlockSpec((1, C_out, 1), lambda n: (n, 0, 0)),
                 pl.BlockSpec((1, C_out, 1), lambda n: (n, 0, 0)))

    y_isz = 2 if y_dtype == jnp.bfloat16 else 4
    block_bytes = (C_in * L * x_cl.dtype.itemsize + C_out * L * y_isz
                   + int(w.size) * w.dtype.itemsize
                   + 2 * L * 4 + 2 * C_in * 4 + 2 * C_out * 4)
    k_eff = (3 * C_in) if three_tap else C_in
    cost = pl.CostEstimate(
        flops=2 * C_out * k_eff * total_L,
        transcendentals=0,
        bytes_accessed=(C_in * total_L * x_cl.dtype.itemsize
                        + C_out * total_L * y_isz
                        + int(w.size) * w.dtype.itemsize
                        + 2 * n_blocks * C_out * 4
                        + (2 * C_in * 4 if pre_act else 0)
                        + (2 * L * 4 if three_tap else 0)))

    y, s, sq = pl.pallas_call(
        kernel,
        out_shape=out_shape,
        grid=(n_blocks,),
        in_specs=in_specs,
        out_specs=out_specs,
        compiler_params=_compiler_params(block_bytes),
        cost_estimate=cost,
    )(*operands)
    return y, s, sq


# ----------------------------------------------------------------------------
# Final BN + ReLU pass (f32 output)
# ----------------------------------------------------------------------------
def _bn_relu_kernel(x_ref, sc_ref, sh_ref, o_ref):
    x = x_ref[...].astype(jnp.float32)
    o_ref[...] = jnp.maximum(x * sc_ref[...] + sh_ref[...], 0.0)


def bn_relu(x_cl, scale, shift, *, bt, hw):
    C, total_L = x_cl.shape
    L = bt * hw
    n_blocks = total_L // L
    block_bytes = C * L * (x_cl.dtype.itemsize + 4) + 2 * C * 4
    return pl.pallas_call(
        _bn_relu_kernel,
        out_shape=jax.ShapeDtypeStruct((C, total_L), jnp.float32),
        grid=(n_blocks,),
        in_specs=[pl.BlockSpec((C, L), lambda n: (0, n)),
                  pl.BlockSpec((C, 1), lambda n: (0, 0)),
                  pl.BlockSpec((C, 1), lambda n: (0, 0))],
        out_specs=pl.BlockSpec((C, L), lambda n: (0, n)),
        compiler_params=_compiler_params(block_bytes),
    )(x_cl, scale, shift)


# ----------------------------------------------------------------------------
# Partial stats -> per-channel BN scale/shift (tiny, plain JAX)
# ----------------------------------------------------------------------------
def _bn_scale_shift(partial_sum, partial_sq, gamma, beta, count):
    s = jnp.sum(partial_sum[:, :, 0], axis=0)
    q = jnp.sum(partial_sq[:, :, 0], axis=0)
    mean = s / count
    # Note: E[y^2]-E[y]^2 in f32 can cancel for extreme N*HW / large-mean
    # activations; fine at LPRNet sizes (validated against the reference).
    var = jnp.maximum(q / count - mean * mean, 0.0)   # biased var (training BN)
    scale = gamma * jax.lax.rsqrt(var + EPS)
    shift = beta - mean * scale
    return (scale.reshape(-1, 1).astype(jnp.float32),
            shift.reshape(-1, 1).astype(jnp.float32))


def _choose_bt(N, HW, c_max, cap=None, budget_bytes=8 << 20):
    """Largest images-per-step whose f32 activation block fits the budget."""
    legal = [bt for bt in range(1, N + 1)
             if N % bt == 0 and (bt == N or (bt * HW) % 128 == 0)]
    if cap is not None:
        capped = [bt for bt in legal if bt <= cap]
        legal = capped or legal[:1]
    fitting = [bt for bt in legal if 4 * c_max * bt * HW <= budget_bytes]
    return max(fitting) if fitting else min(legal)


# ----------------------------------------------------------------------------
# SmallBlock forward (NCHW in / NCHW out, like the PyTorch module)
# ----------------------------------------------------------------------------
def small_block_forward(x_nchw, params, *, block_images=None):
    (w1, g1, b1), (w2, g2, b2), (w3, g3, b3), (w4, g4, b4) = params
    N, Cin, H, W = x_nchw.shape
    c4 = w1.shape[0]
    out_ch = w4.shape[0]
    HW = H * W
    count = float(N * HW)

    # Channels-leading (C, N*HW): one tiny transpose in/out, all kernels see
    # lane-dense multi-image blocks.
    x_cl = jnp.transpose(x_nchw.reshape(N, Cin, HW), (1, 0, 2)).reshape(Cin, N * HW)
    x_cl = x_cl.astype(jnp.float32)

    bt = _choose_bt(N, HW, max(Cin, c4, out_ch), cap=block_images)
    L = bt * HW
    # Note: if bt < N we require bt*HW % 128 == 0; otherwise we fall back to
    # the full-array block (always legal).  For real LPRNet spatial sizes where
    # HW isn't 128-aligned, verify pltpu.roll on the lane-padded layout.

    # Weight packing (bf16 MXU operands).  When c4 is sublane-aligned (real
    # LPRNet: 32/64) the three taps are fused into one K=3*c4 weight; otherwise
    # keep a (3, Cout, Cin) tap stack and do 3 dots.
    fuse_k = (c4 % 8 == 0)
    w1p = w1[:, :, 0, 0].astype(jnp.bfloat16)                       # (c4, Cin)
    w4p = w4[:, :, 0, 0].astype(jnp.bfloat16)                       # (out, c4)
    taps2 = (w2[:, :, 0, 0], w2[:, :, 1, 0], w2[:, :, 2, 0])        # h-1, h, h+1
    taps3 = (w3[:, :, 0, 0], w3[:, :, 0, 1], w3[:, :, 0, 2])        # w-1, w, w+1
    if fuse_k:
        w2p = jnp.concatenate(taps2, axis=1).astype(jnp.bfloat16)   # (c4, 3*c4)
        w3p = jnp.concatenate(taps3, axis=1).astype(jnp.bfloat16)
    else:
        w2p = jnp.stack(taps2, axis=0).astype(jnp.bfloat16)         # (3, c4, c4)
        w3p = jnp.stack(taps3, axis=0).astype(jnp.bfloat16)

    # Grid-invariant boundary masks, hoisted out of the kernels (VMEM resident).
    pos = jnp.arange(L, dtype=jnp.int32)
    pin = pos % HW
    wcol = pos % W
    mh = (jnp.reshape((pin >= W).astype(jnp.float32), (1, L)),
          jnp.reshape((pin < HW - W).astype(jnp.float32), (1, L)))
    mw = (jnp.reshape((wcol >= 1).astype(jnp.float32), (1, L)),
          jnp.reshape((wcol <= W - 2).astype(jnp.float32), (1, L)))

    # L1: conv 1x1                         -> stats1
    y1, s1, q1 = fused_layer(x_cl, w1p, bt=bt, hw=HW)
    sc1, sh1 = _bn_scale_shift(s1, q1, g1, b1, count)
    # L2: BN1+ReLU -> conv (3,1), pad(1,0) -> stats2
    y2, s2, q2 = fused_layer(y1, w2p, bt=bt, hw=HW, pre_act=True,
                             scale_prev=sc1, shift_prev=sh1,
                             three_tap=True, fuse_k=fuse_k, step=W, masks=mh)
    sc2, sh2 = _bn_scale_shift(s2, q2, g2, b2, count)
    # L3: BN2+ReLU -> conv (1,3), pad(0,1) -> stats3
    y3, s3, q3 = fused_layer(y2, w3p, bt=bt, hw=HW, pre_act=True,
                             scale_prev=sc2, shift_prev=sh2,
                             three_tap=True, fuse_k=fuse_k, step=1, masks=mw)
    sc3, sh3 = _bn_scale_shift(s3, q3, g3, b3, count)
    # L4: BN3+ReLU -> conv 1x1             -> stats4
    y4, s4, q4 = fused_layer(y3, w4p, bt=bt, hw=HW, pre_act=True,
                             scale_prev=sc3, shift_prev=sh3)
    sc4, sh4 = _bn_scale_shift(s4, q4, g4, b4, count)
    # Final BN4 + ReLU (f32 out)
    out_cl = bn_relu(y4, sc4, sh4, bt=bt, hw=HW)                    # (out, N*HW)

    out = jnp.transpose(out_cl.reshape(out_ch, N, HW), (1, 0, 2))
    return out.reshape(N, out_ch, H, W)


# ----------------------------------------------------------------------------
# Deterministic parameter init (shapes from SmallBlock.__init__)
# ----------------------------------------------------------------------------
def init_params(key, in_ch, out_ch):
    c4 = out_ch // 4
    k1, k2, k3, k4 = jax.random.split(key, 4)
    w1 = jax.random.normal(k1, (c4, in_ch, 1, 1), jnp.float32) * 0.2
    w2 = jax.random.normal(k2, (c4, c4, 3, 1), jnp.float32) * 0.2
    w3 = jax.random.normal(k3, (c4, c4, 1, 3), jnp.float32) * 0.2
    w4 = jax.random.normal(k4, (out_ch, c4, 1, 1), jnp.float32) * 0.2
    bn = lambda c: (jnp.ones((c,), jnp.float32), jnp.zeros((c,), jnp.float32))
    return ((w1, *bn(c4)), (w2, *bn(c4)), (w3, *bn(c4)), (w4, *bn(out_ch)))


# ----------------------------------------------------------------------------
# Pure-JAX reference (lax.conv, all f32) for a correctness check
# ----------------------------------------------------------------------------
def _ref_layer(x, w, gamma, beta, pad):
    y = jax.lax.conv_general_dilated(
        x, w, window_strides=(1, 1), padding=pad,
        dimension_numbers=("NCHW", "OIHW", "NCHW"))
    mean = jnp.mean(y, axis=(0, 2, 3), keepdims=True)
    var = jnp.mean((y - mean) ** 2, axis=(0, 2, 3), keepdims=True)
    yn = (y - mean) * jax.lax.rsqrt(var + EPS)
    return jnp.maximum(yn * gamma[None, :, None, None] + beta[None, :, None, None], 0.0)


def small_block_ref(x, params):
    (w1, g1, b1), (w2, g2, b2), (w3, g3, b3), (w4, g4, b4) = params
    y = _ref_layer(x, w1, g1, b1, [(0, 0), (0, 0)])
    y = _ref_layer(y, w2, g2, b2, [(1, 1), (0, 0)])
    y = _ref_layer(y, w3, g3, b3, [(0, 0), (1, 1)])
    y = _ref_layer(y, w4, g4, b4, [(0, 0), (0, 0)])
    return y


if __name__ == "__main__":
    key = jax.random.PRNGKey(0)
    kx, kp = jax.random.split(key)

    in_ch, out_ch = 4, 16
    N, H, W = 4, 16, 16
    x = jax.random.normal(kx, (N, in_ch, H, W), jnp.float32)
    params = init_params(kp, in_ch, out_ch)

    # block_images=2 -> 2 images per grid step, 2 grid steps: exercises the
    # multi-image blocks, per-step partial stats and the cross-image masks.
    fwd = jax.jit(functools.partial(small_block_forward, block_images=2))
    out = jax.block_until_ready(fwd(x, params))
    assert out.shape == (N, out_ch, H, W), out.shape

    ref = jax.block_until_ready(small_block_ref(x, params))
    max_err = float(jnp.max(jnp.abs(out - ref)))
    # Tolerance is looser than the all-f32 v1 kernel because inter-layer
    # activations are stored in bf16 and MXU operands are bf16 (f32 accumulate);
    # post-BN values are O(1).
    if not jnp.allclose(out, ref, rtol=5e-2, atol=5e-2):
        raise AssertionError(f"mismatch vs reference, max abs err = {max_err:e}")

    print("KERNEL_OK")
</pallas_src>

<mosaic_0001>
module attributes {stable_mosaic.version = 11 : i64} {
  func.func @kernel(%arg0: i32, %arg1: memref<4x512xf32, #tpu.memory_space<vmem>>, %arg2: memref<4x4xbf16, #tpu.memory_space<vmem>>, %arg3: memref<4x512xbf16, #tpu.memory_space<vmem>>, %arg4: memref<1x4x1xf32, #tpu.memory_space<vmem>>, %arg5: memref<1x4x1xf32, #tpu.memory_space<vmem>>) attributes {dimension_semantics = [#tpu.dimension_semantics<parallel>], iteration_bounds = array<i64: 2>, scalar_prefetch = 0 : i64, scratch_operands = 0 : i64, tpu.core_type = #tpu.core_type<tc>, window_params = [{transform_indices = @transform_0, window_bounds = array<i64: 4, 512>}, {pipeline_mode = #tpu.pipeline_mode<synchronous>, transform_indices = @transform_1, window_bounds = array<i64: 4, 4>}, {transform_indices = @transform_2, window_bounds = array<i64: 4, 512>}, {transform_indices = @transform_3, window_bounds = array<i64: 1, 4, 1>}, {transform_indices = @transform_4, window_bounds = array<i64: 1, 4, 1>}]} {
    %c0 = arith.constant 0 : index
    %c0_0 = arith.constant 0 : index
    %0 = vector.load %arg1[%c0, %c0_0] : memref<4x512xf32, #tpu.memory_space<vmem>>, vector<4x512xf32>
    %c0_1 = arith.constant 0 : index
    %c0_2 = arith.constant 0 : index
    %1 = vector.load %arg2[%c0_1, %c0_2] : memref<4x4xbf16, #tpu.memory_space<vmem>>, vector<4x4xbf16>
    %2 = arith.truncf %0 : vector<4x512xf32> to vector<4x512xbf16>
    %cst = arith.constant dense<0.000000e+00> : vector<4x512xf32>
    %3 = tpu.matmul %1, %2, %cst {dimension_numbers = #tpu.dot_dimension_numbers<[1], [0], [0], [1], [0, 0, 1, 1], [], []>} : vector<4x4xbf16>, vector<4x512xbf16>, vector<4x512xf32> -> vector<4x512xf32>
    %4 = arith.truncf %3 : vector<4x512xf32> to vector<4x512xbf16>
    %c0_3 = arith.constant 0 : index
    %c0_4 = arith.constant 0 : index
    %5 = vector.load %arg3[%c0_3, %c0_4] : memref<4x512xbf16, #tpu.memory_space<vmem>>, vector<4x512xbf16>
    tpu.vector_store %arg3[%c0_3, %c0_4], %4 {strides = array<i32>} : memref<4x512xbf16, #tpu.memory_space<vmem>>, vector<4x512xbf16>,
    %cst_5 = arith.constant dense<0.000000e+00> : vector<4xf32>
    %6 = vector.multi_reduction <add>, %3, %cst_5 [1] : vector<4x512xf32> to vector<4xf32>
    %7 = vector.shape_cast %6 : vector<4xf32> to vector<4x1xf32>
    %c0_6 = arith.constant 0 : index
    %c0_7 = arith.constant 0 : index
    %c0_8 = arith.constant 0 : index
    %8 = vector.load %arg4[%c0_6, %c0_7, %c0_8] : memref<1x4x1xf32, #tpu.memory_space<vmem>>, vector<1x4x1xf32>
    %9 = vector.shape_cast %8 : vector<1x4x1xf32> to vector<4x1xf32>
    %10 = vector.shape_cast %7 : vector<4x1xf32> to vector<1x4x1xf32>
    tpu.vector_store %arg4[%c0_6, %c0_7, %c0_8], %10 {strides = array<i32>} : memref<1x4x1xf32, #tpu.memory_space<vmem>>, vector<1x4x1xf32>,
    %11 = arith.mulf %3, %3 : vector<4x512xf32>
    %cst_9 = arith.constant dense<0.000000e+00> : vector<4xf32>
    %12 = vector.multi_reduction <add>, %11, %cst_9 [1] : vector<4x512xf32> to vector<4xf32>
    %13 = vector.shape_cast %12 : vector<4xf32> to vector<4x1xf32>
    %c0_10 = arith.constant 0 : index
    %c0_11 = arith.constant 0 : index
    %c0_12 = arith.constant 0 : index
    %14 = vector.load %arg5[%c0_10, %c0_11, %c0_12] : memref<1x4x1xf32, #tpu.memory_space<vmem>>, vector<1x4x1xf32>
    %15 = vector.shape_cast %14 : vector<1x4x1xf32> to vector<4x1xf32>
    %16 = vector.shape_cast %13 : vector<4x1xf32> to vector<1x4x1xf32>
    tpu.vector_store %arg5[%c0_10, %c0_11, %c0_12], %16 {strides = array<i32>} : memref<1x4x1xf32, #tpu.memory_space<vmem>>, vector<1x4x1xf32>,
    return
  }
  func.func @transform_0(%arg0: i32) -> (i32, i32) {
    %c0_i32 = arith.constant 0 : i32
    %c0_i32_0 = arith.constant 0 : i32
    return %c0_i32, %arg0 : i32, i32
  }
  func.func @transform_1(%arg0: i32) -> (i32, i32) {
    %c0_i32 = arith.constant 0 : i32
    %c0_i32_0 = arith.constant 0 : i32
    %c0_i32_1 = arith.constant 0 : i32
    return %c0_i32, %c0_i32_0 : i32, i32
  }
  func.func @transform_2(%arg0: i32) -> (i32, i32) {
    %c0_i32 = arith.constant 0 : i32
    %c0_i32_0 = arith.constant 0 : i32
    return %c0_i32, %arg0 : i32, i32
  }
  func.func @transform_3(%arg0: i32) -> (i32, i32, i32) {
    %c0_i32 = arith.constant 0 : i32
    %c0_i32_0 = arith.constant 0 : i32
    %c0_i32_1 = arith.constant 0 : i32
    return %arg0, %c0_i32, %c0_i32_0 : i32, i32, i32
  }
  func.func @transform_4(%arg0: i32) -> (i32, i32, i32) {
    %c0_i32 = arith.constant 0 : i32
    %c0_i32_0 = arith.constant 0 : i32
    %c0_i32_1 = arith.constant 0 : i32
    return %arg0, %c0_i32, %c0_i32_0 : i32, i32, i32
  }
}

module attributes {stable_mosaic.version = 11 : i64} {
  func.func @kernel(%arg0: i32, %arg1: memref<4x512xbf16, #tpu.memory_space<vmem>>, %arg2: memref<3x4x4xbf16, #tpu.memory_space<vmem>>, %arg3: memref<4x1xf32, #tpu.memory_space<vmem>>, %arg4: memref<4x1xf32, #tpu.memory_space<vmem>>, %arg5: memref<1x512xf32, #tpu.memory_space<vmem>>, %arg6: memref<1x512xf32, #tpu.memory_space<vmem>>, %arg7: memref<4x512xbf16, #tpu.memory_space<vmem>>, %arg8: memref<1x4x1xf32, #tpu.memory_space<vmem>>, %arg9: memref<1x4x1xf32, #tpu.memory_space<vmem>>) attributes {dimension_semantics = [#tpu.dimension_semantics<parallel>], iteration_bounds = array<i64: 2>, scalar_prefetch = 0 : i64, scratch_operands = 0 : i64, tpu.core_type = #tpu.core_type<tc>, window_params = [{transform_indices = @transform_0, window_bounds = array<i64: 4, 512>}, {pipeline_mode = #tpu.pipeline_mode<synchronous>, transform_indices = @transform_1, window_bounds = array<i64: 3, 4, 4>}, {pipeline_mode = #tpu.pipeline_mode<synchronous>, transform_indices = @transform_2, window_bounds = array<i64: 4, 1>}, {pipeline_mode = #tpu.pipeline_mode<synchronous>, transform_indices = @transform_3, window_bounds = array<i64: 4, 1>}, {pipeline_mode = #tpu.pipeline_mode<synchronous>, transform_indices = @transform_4, window_bounds = array<i64: 1, 512>}, {pipeline_mode = #tpu.pipeline_mode<synchronous>, transform_indices = @transform_5, window_bounds = array<i64: 1, 512>}, {transform_indices = @transform_6, window_bounds = array<i64: 4, 512>}, {transform_indices = @transform_7, window_bounds = array<i64: 1, 4, 1>}, {transform_indices = @transform_8, window_bounds = array<i64: 1, 4, 1>}]} {
    %c0 = arith.constant 0 : index
    %c0_0 = arith.constant 0 : index
    %0 = vector.load %arg1[%c0, %c0_0] : memref<4x512xbf16, #tpu.memory_space<vmem>>, vector<4x512xbf16>
    %1 = arith.extf %0 : vector<4x512xbf16> to vector<4x512xf32>
    %c0_1 = arith.constant 0 : index
    %c0_2 = arith.constant 0 : index
    %2 = vector.load %arg3[%c0_1, %c0_2] : memref<4x1xf32, #tpu.memory_space<vmem>>, vector<4x1xf32>
    %3 = vector.broadcast %2 : vector<4x1xf32> to vector<4x512xf32>
    %4 = arith.mulf %1, %3 : vector<4x512xf32>
    %c0_3 = arith.constant 0 : index
    %c0_4 = arith.constant 0 : index
    %5 = vector.load %arg4[%c0_3, %c0_4] : memref<4x1xf32, #tpu.memory_space<vmem>>, vector<4x1xf32>
    %6 = vector.broadcast %5 : vector<4x1xf32> to vector<4x512xf32>
    %7 = arith.addf %4, %6 : vector<4x512xf32>
    %cst = arith.constant 0.000000e+00 : f32
    %8 = vector.broadcast %cst : f32 to vector<4x512xf32>
    %9 = arith.maximumf %7, %8 : vector<4x512xf32>
    %c16_i32 = arith.constant 16 : i32
    %10 = tpu.dynamic_rotate %9 by %c16_i32 dim 1 : vector<4x512xf32>, i32 -> vector<4x512xf32>
    %c0_5 = arith.constant 0 : index
    %c0_6 = arith.constant 0 : index
    %11 = vector.load %arg5[%c0_5, %c0_6] : memref<1x512xf32, #tpu.memory_space<vmem>>, vector<1x512xf32>
    %12 = vector.broadcast %11 : vector<1x512xf32> to vector<4x512xf32>
    %13 = arith.mulf %10, %12 : vector<4x512xf32>
    %c496_i32 = arith.constant 496 : i32
    %14 = tpu.dynamic_rotate %9 by %c496_i32 dim 1 : vector<4x512xf32>, i32 -> vector<4x512xf32>
    %c0_7 = arith.constant 0 : index
    %c0_8 = arith.constant 0 : index
    %15 = vector.load %arg6[%c0_7, %c0_8] : memref<1x512xf32, #tpu.memory_space<vmem>>, vector<1x512xf32>
    %16 = vector.broadcast %15 : vector<1x512xf32> to vector<4x512xf32>
    %17 = arith.mulf %14, %16 : vector<4x512xf32>
    %c0_9 = arith.constant 0 : index
    %c0_10 = arith.constant 0 : index
    %c0_11 = arith.constant 0 : index
    %18 = vector.load %arg2[%c0_9, %c0_10, %c0_11] : memref<3x4x4xbf16, #tpu.memory_space<vmem>>, vector<1x4x4xbf16>
    %19 = vector.shape_cast %18 : vector<1x4x4xbf16> to vector<4x4xbf16>
    %20 = arith.truncf %13 : vector<4x512xf32> to vector<4x512xbf16>
    %cst_12 = arith.constant dense<0.000000e+00> : vector<4x512xf32>
    %21 = tpu.matmul %19, %20, %cst_12 {dimension_numbers = #tpu.dot_dimension_numbers<[1], [0], [0], [1], [0, 0, 1, 1], [], []>} : vector<4x4xbf16>, vector<4x512xbf16>, vector<4x512xf32> -> vector<4x512xf32>
    %c1 = arith.constant 1 : index
    %c0_13 = arith.constant 0 : index
    %c0_14 = arith.constant 0 : index
    %22 = vector.load %arg2[%c1, %c0_13, %c0_14] : memref<3x4x4xbf16, #tpu.memory_space<vmem>>, vector<1x4x4xbf16>
    %23 = vector.shape_cast %22 : vector<1x4x4xbf16> to vector<4x4xbf16>
    %24 = arith.truncf %9 : vector<4x512xf32> to vector<4x512xbf16>
    %cst_15 = arith.constant dense<0.000000e+00> : vector<4x512xf32>
    %25 = tpu.matmul %23, %24, %cst_15 {dimension_numbers = #tpu.dot_dimension_numbers<[1], [0], [0], [1], [0, 0, 1, 1], [], []>} : vector<4x4xbf16>, vector<4x512xbf16>, vector<4x512xf32> -> vector<4x512xf32>
    %26 = arith.addf %21, %25 : vector<4x512xf32>
    %c2 = arith.constant 2 : index
    %c0_16 = arith.constant 0 : index
    %c0_17 = arith.constant 0 : index
    %27 = vector.load %arg2[%c2, %c0_16, %c0_17] : memref<3x4x4xbf16, #tpu.memory_space<vmem>>, vector<1x4x4xbf16>
    %28 = vector.shape_cast %27 : vector<1x4x4xbf16> to vector<4x4xbf16>
    %29 = arith.truncf %17 : vector<4x512xf32> to vector<4x512xbf16>
    %cst_18 = arith.constant dense<0.000000e+00> : vector<4x512xf32>
    %30 = tpu.matmul %28, %29, %cst_18 {dimension_numbers = #tpu.dot_dimension_numbers<[1], [0], [0], [1], [0, 0, 1, 1], [], []>} : vector<4x4xbf16>, vector<4x512xbf16>, vector<4x512xf32> -> vector<4x512xf32>
    %31 = arith.addf %26, %30 : vector<4x512xf32>
    %32 = arith.truncf %31 : vector<4x512xf32> to vector<4x512xbf16>
    %c0_19 = arith.constant 0 : index
    %c0_20 = arith.constant 0 : index
    %33 = vector.load %arg7[%c0_19, %c0_20] : memref<4x512xbf16, #tpu.memory_space<vmem>>, vector<4x512xbf16>
    tpu.vector_store %arg7[%c0_19, %c0_20], %32 {strides = array<i32>} : memref<4x512xbf16, #tpu.memory_space<vmem>>, vector<4x512xbf16>,
    %cst_21 = arith.constant dense<0.000000e+00> : vector<4xf32>
    %34 = vector.multi_reduction <add>, %31, %cst_21 [1] : vector<4x512xf32> to vector<4xf32>
    %35 = vector.shape_cast %34 : vector<4xf32> to vector<4x1xf32>
    %c0_22 = arith.constant 0 : index
    %c0_23 = arith.constant 0 : index
    %c0_24 = arith.constant 0 : index
    %36 = vector.load %arg8[%c0_22, %c0_23, %c0_24] : memref<1x4x1xf32, #tpu.memory_space<vmem>>, vector<1x4x1xf32>
    %37 = vector.shape_cast %36 : vector<1x4x1xf32> to vector<4x1xf32>
    %38 = vector.shape_cast %35 : vector<4x1xf32> to vector<1x4x1xf32>
    tpu.vector_store %arg8[%c0_22, %c0_23, %c0_24], %38 {strides = array<i32>} : memref<1x4x1xf32, #tpu.memory_space<vmem>>, vector<1x4x1xf32>,
    %39 = arith.mulf %31, %31 : vector<4x512xf32>
    %cst_25 = arith.constant dense<0.000000e+00> : vector<4xf32>
    %40 = vector.multi_reduction <add>, %39, %cst_25 [1] : vector<4x512xf32> to vector<4xf32>
    %41 = vector.shape_cast %40 : vector<4xf32> to vector<4x1xf32>
    %c0_26 = arith.constant 0 : index
    %c0_27 = arith.constant 0 : index
    %c0_28 = arith.constant 0 : index
    %42 = vector.load %arg9[%c0_26, %c0_27, %c0_28] : memref<1x4x1xf32, #tpu.memory_space<vmem>>, vector<1x4x1xf32>
    %43 = vector.shape_cast %42 : vector<1x4x1xf32> to vector<4x1xf32>
    %44 = vector.shape_cast %41 : vector<4x1xf32> to vector<1x4x1xf32>
    tpu.vector_store %arg9[%c0_26, %c0_27, %c0_28], %44 {strides = array<i32>} : memref<1x4x1xf32, #tpu.memory_space<vmem>>, vector<1x4x1xf32>,
    return
  }
  func.func @transform_0(%arg0: i32) -> (i32, i32) {
    %c0_i32 = arith.constant 0 : i32
    %c0_i32_0 = arith.constant 0 : i32
    return %c0_i32, %arg0 : i32, i32
  }
  func.func @transform_1(%arg0: i32) -> (i32, i32, i32) {
    %c0_i32 = arith.constant 0 : i32
    %c0_i32_0 = arith.constant 0 : i32
    %c0_i32_1 = arith.constant 0 : i32
    %c0_i32_2 = arith.constant 0 : i32
    return %c0_i32, %c0_i32_0, %c0_i32_1 : i32, i32, i32
  }
  func.func @transform_2(%arg0: i32) -> (i32, i32) {
    %c0_i32 = arith.constant 0 : i32
    %c0_i32_0 = arith.constant 0 : i32
    %c0_i32_1 = arith.constant 0 : i32
    return %c0_i32, %c0_i32_0 : i32, i32
  }
  func.func @transform_3(%arg0: i32) -> (i32, i32) {
    %c0_i32 = arith.constant 0 : i32
    %c0_i32_0 = arith.constant 0 : i32
    %c0_i32_1 = arith.constant 0 : i32
    return %c0_i32, %c0_i32_0 : i32, i32
  }
  func.func @transform_4(%arg0: i32) -> (i32, i32) {
    %c0_i32 = arith.constant 0 : i32
    %c0_i32_0 = arith.constant 0 : i32
    %c0_i32_1 = arith.constant 0 : i32
    return %c0_i32, %c0_i32_0 : i32, i32
  }
  func.func @transform_5(%arg0: i32) -> (i32, i32) {
    %c0_i32 = arith.constant 0 : i32
    %c0_i32_0 = arith.constant 0 : i32
    %c0_i32_1 = arith.constant 0 : i32
    return %c0_i32, %c0_i32_0 : i32, i32
  }
  func.func @transform_6(%arg0: i32) -> (i32, i32) {
    %c0_i32 = arith.constant 0 : i32
    %c0_i32_0 = arith.constant 0 : i32
    return %c0_i32, %arg0 : i32, i32
  }
  func.func @transform_7(%arg0: i32) -> (i32, i32, i32) {
    %c0_i32 = arith.constant 0 : i32
    %c0_i32_0 = arith.constant 0 : i32
    %c0_i32_1 = arith.constant 0 : i32
    return %arg0, %c0_i32, %c0_i32_0 : i32, i32, i32
  }
  func.func @transform_8(%arg0: i32) -> (i32, i32, i32) {
    %c0_i32 = arith.constant 0 : i32
    %c0_i32_0 = arith.constant 0 : i32
    %c0_i32_1 = arith.constant 0 : i32
    return %arg0, %c0_i32, %c0_i32_0 : i32, i32, i32
  }
}

module attributes {stable_mosaic.version = 11 : i64} {
  func.func @kernel(%arg0: i32, %arg1: memref<4x512xbf16, #tpu.memory_space<vmem>>, %arg2: memref<3x4x4xbf16, #tpu.memory_space<vmem>>, %arg3: memref<4x1xf32, #tpu.memory_space<vmem>>, %arg4: memref<4x1xf32, #tpu.memory_space<vmem>>, %arg5: memref<1x512xf32, #tpu.memory_space<vmem>>, %arg6: memref<1x512xf32, #tpu.memory_space<vmem>>, %arg7: memref<4x512xbf16, #tpu.memory_space<vmem>>, %arg8: memref<1x4x1xf32, #tpu.memory_space<vmem>>, %arg9: memref<1x4x1xf32, #tpu.memory_space<vmem>>) attributes {dimension_semantics = [#tpu.dimension_semantics<parallel>], iteration_bounds = array<i64: 2>, scalar_prefetch = 0 : i64, scratch_operands = 0 : i64, tpu.core_type = #tpu.core_type<tc>, window_params = [{transform_indices = @transform_0, window_bounds = array<i64: 4, 512>}, {pipeline_mode = #tpu.pipeline_mode<synchronous>, transform_indices = @transform_1, window_bounds = array<i64: 3, 4, 4>}, {pipeline_mode = #tpu.pipeline_mode<synchronous>, transform_indices = @transform_2, window_bounds = array<i64: 4, 1>}, {pipeline_mode = #tpu.pipeline_mode<synchronous>, transform_indices = @transform_3, window_bounds = array<i64: 4, 1>}, {pipeline_mode = #tpu.pipeline_mode<synchronous>, transform_indices = @transform_4, window_bounds = array<i64: 1, 512>}, {pipeline_mode = #tpu.pipeline_mode<synchronous>, transform_indices = @transform_5, window_bounds = array<i64: 1, 512>}, {transform_indices = @transform_6, window_bounds = array<i64: 4, 512>}, {transform_indices = @transform_7, window_bounds = array<i64: 1, 4, 1>}, {transform_indices = @transform_8, window_bounds = array<i64: 1, 4, 1>}]} {
    %c0 = arith.constant 0 : index
    %c0_0 = arith.constant 0 : index
    %0 = vector.load %arg1[%c0, %c0_0] : memref<4x512xbf16, #tpu.memory_space<vmem>>, vector<4x512xbf16>
    %1 = arith.extf %0 : vector<4x512xbf16> to vector<4x512xf32>
    %c0_1 = arith.constant 0 : index
    %c0_2 = arith.constant 0 : index
    %2 = vector.load %arg3[%c0_1, %c0_2] : memref<4x1xf32, #tpu.memory_space<vmem>>, vector<4x1xf32>
    %3 = vector.broadcast %2 : vector<4x1xf32> to vector<4x512xf32>
    %4 = arith.mulf %1, %3 : vector<4x512xf32>
    %c0_3 = arith.constant 0 : index
    %c0_4 = arith.constant 0 : index
    %5 = vector.load %arg4[%c0_3, %c0_4] : memref<4x1xf32, #tpu.memory_space<vmem>>, vector<4x1xf32>
    %6 = vector.broadcast %5 : vector<4x1xf32> to vector<4x512xf32>
    %7 = arith.addf %4, %6 : vector<4x512xf32>
    %cst = arith.constant 0.000000e+00 : f32
    %8 = vector.broadcast %cst : f32 to vector<4x512xf32>
    %9 = arith.maximumf %7, %8 : vector<4x512xf32>
    %c1_i32 = arith.constant 1 : i32
    %10 = tpu.dynamic_rotate %9 by %c1_i32 dim 1 : vector<4x512xf32>, i32 -> vector<4x512xf32>
    %c0_5 = arith.constant 0 : index
    %c0_6 = arith.constant 0 : index
    %11 = vector.load %arg5[%c0_5, %c0_6] : memref<1x512xf32, #tpu.memory_space<vmem>>, vector<1x512xf32>
    %12 = vector.broadcast %11 : vector<1x512xf32> to vector<4x512xf32>
    %13 = arith.mulf %10, %12 : vector<4x512xf32>
    %c511_i32 = arith.constant 511 : i32
    %14 = tpu.dynamic_rotate %9 by %c511_i32 dim 1 : vector<4x512xf32>, i32 -> vector<4x512xf32>
    %c0_7 = arith.constant 0 : index
    %c0_8 = arith.constant 0 : index
    %15 = vector.load %arg6[%c0_7, %c0_8] : memref<1x512xf32, #tpu.memory_space<vmem>>, vector<1x512xf32>
    %16 = vector.broadcast %15 : vector<1x512xf32> to vector<4x512xf32>
    %17 = arith.mulf %14, %16 : vector<4x512xf32>
    %c0_9 = arith.constant 0 : index
    %c0_10 = arith.constant 0 : index
    %c0_11 = arith.constant 0 : index
    %18 = vector.load %arg2[%c0_9, %c0_10, %c0_11] : memref<3x4x4xbf16, #tpu.memory_space<vmem>>, vector<1x4x4xbf16>
    %19 = vector.shape_cast %18 : vector<1x4x4xbf16> to vector<4x4xbf16>
    %20 = arith.truncf %13 : vector<4x512xf32> to vector<4x512xbf16>
    %cst_12 = arith.constant dense<0.000000e+00> : vector<4x512xf32>
    %21 = tpu.matmul %19, %20, %cst_12 {dimension_numbers = #tpu.dot_dimension_numbers<[1], [0], [0], [1], [0, 0, 1, 1], [], []>} : vector<4x4xbf16>, vector<4x512xbf16>, vector<4x512xf32> -> vector<4x512xf32>
    %c1 = arith.constant 1 : index
    %c0_13 = arith.constant 0 : index
    %c0_14 = arith.constant 0 : index
    %22 = vector.load %arg2[%c1, %c0_13, %c0_14] : memref<3x4x4xbf16, #tpu.memory_space<vmem>>, vector<1x4x4xbf16>
    %23 = vector.shape_cast %22 : vector<1x4x4xbf16> to vector<4x4xbf16>
    %24 = arith.truncf %9 : vector<4x512xf32> to vector<4x512xbf16>
    %cst_15 = arith.constant dense<0.000000e+00> : vector<4x512xf32>
    %25 = tpu.matmul %23, %24, %cst_15 {dimension_numbers = #tpu.dot_dimension_numbers<[1], [0], [0], [1], [0, 0, 1, 1], [], []>} : vector<4x4xbf16>, vector<4x512xbf16>, vector<4x512xf32> -> vector<4x512xf32>
    %26 = arith.addf %21, %25 : vector<4x512xf32>
    %c2 = arith.constant 2 : index
    %c0_16 = arith.constant 0 : index
    %c0_17 = arith.constant 0 : index
    %27 = vector.load %arg2[%c2, %c0_16, %c0_17] : memref<3x4x4xbf16, #tpu.memory_space<vmem>>, vector<1x4x4xbf16>
    %28 = vector.shape_cast %27 : vector<1x4x4xbf16> to vector<4x4xbf16>
    %29 = arith.truncf %17 : vector<4x512xf32> to vector<4x512xbf16>
    %cst_18 = arith.constant dense<0.000000e+00> : vector<4x512xf32>
    %30 = tpu.matmul %28, %29, %cst_18 {dimension_numbers = #tpu.dot_dimension_numbers<[1], [0], [0], [1], [0, 0, 1, 1], [], []>} : vector<4x4xbf16>, vector<4x512xbf16>, vector<4x512xf32> -> vector<4x512xf32>
    %31 = arith.addf %26, %30 : vector<4x512xf32>
    %32 = arith.truncf %31 : vector<4x512xf32> to vector<4x512xbf16>
    %c0_19 = arith.constant 0 : index
    %c0_20 = arith.constant 0 : index
    %33 = vector.load %arg7[%c0_19, %c0_20] : memref<4x512xbf16, #tpu.memory_space<vmem>>, vector<4x512xbf16>
    tpu.vector_store %arg7[%c0_19, %c0_20], %32 {strides = array<i32>} : memref<4x512xbf16, #tpu.memory_space<vmem>>, vector<4x512xbf16>,
    %cst_21 = arith.constant dense<0.000000e+00> : vector<4xf32>
    %34 = vector.multi_reduction <add>, %31, %cst_21 [1] : vector<4x512xf32> to vector<4xf32>
    %35 = vector.shape_cast %34 : vector<4xf32> to vector<4x1xf32>
    %c0_22 = arith.constant 0 : index
    %c0_23 = arith.constant 0 : index
    %c0_24 = arith.constant 0 : index
    %36 = vector.load %arg8[%c0_22, %c0_23, %c0_24] : memref<1x4x1xf32, #tpu.memory_space<vmem>>, vector<1x4x1xf32>
    %37 = vector.shape_cast %36 : vector<1x4x1xf32> to vector<4x1xf32>
    %38 = vector.shape_cast %35 : vector<4x1xf32> to vector<1x4x1xf32>
    tpu.vector_store %arg8[%c0_22, %c0_23, %c0_24], %38 {strides = array<i32>} : memref<1x4x1xf32, #tpu.memory_space<vmem>>, vector<1x4x1xf32>,
    %39 = arith.mulf %31, %31 : vector<4x512xf32>
    %cst_25 = arith.constant dense<0.000000e+00> : vector<4xf32>
    %40 = vector.multi_reduction <add>, %39, %cst_25 [1] : vector<4x512xf32> to vector<4xf32>
    %41 = vector.shape_cast %40 : vector<4xf32> to vector<4x1xf32>
    %c0_26 = arith.constant 0 : index
    %c0_27 = arith.constant 0 : index
    %c0_28 = arith.constant 0 : index
    %42 = vector.load %arg9[%c0_26, %c0_27, %c0_28] : memref<1x4x1xf32, #tpu.memory_space<vmem>>, vector<1x4x1xf32>
    %43 = vector.shape_cast %42 : vector<1x4x1xf32> to vector<4x1xf32>
    %44 = vector.shape_cast %41 : vector<4x1xf32> to vector<1x4x1xf32>
    tpu.vector_store %arg9[%c0_26, %c0_27, %c0_28], %44 {strides = array<i32>} : memref<1x4x1xf32, #tpu.memory_space<vmem>>, vector<1x4x1xf32>,
    return
  }
  func.func @transform_0(%arg0: i32) -> (i32, i32) {
    %c0_i32 = arith.constant 0 : i32
    %c0_i32_0 = arith.constant 0 : i32
    return %c0_i32, %arg0 : i32, i32
  }
  func.func @transform_1(%arg0: i32) -> (i32, i32, i32) {
    %c0_i32 = arith.constant 0 : i32
    %c0_i32_0 = arith.constant 0 : i32
    %c0_i32_1 = arith.constant 0 : i32
    %c0_i32_2 = arith.constant 0 : i32
    return %c0_i32, %c0_i32_0, %c0_i32_1 : i32, i32, i32
  }
  func.func @transform_2(%arg0: i32) -> (i32, i32) {
    %c0_i32 = arith.constant 0 : i32
    %c0_i32_0 = arith.constant 0 : i32
    %c0_i32_1 = arith.constant 0 : i32
    return %c0_i32, %c0_i32_0 : i32, i32
  }
  func.func @transform_3(%arg0: i32) -> (i32, i32) {
    %c0_i32 = arith.constant 0 : i32
    %c0_i32_0 = arith.constant 0 : i32
    %c0_i32_1 = arith.constant 0 : i32
    return %c0_i32, %c0_i32_0 : i32, i32
  }
  func.func @transform_4(%arg0: i32) -> (i32, i32) {
    %c0_i32 = arith.constant 0 : i32
    %c0_i32_0 = arith.constant 0 : i32
    %c0_i32_1 = arith.constant 0 : i32
    return %c0_i32, %c0_i32_0 : i32, i32
  }
  func.func @transform_5(%arg0: i32) -> (i32, i32) {
    %c0_i32 = arith.constant 0 : i32
    %c0_i32_0 = arith.constant 0 : i32
    %c0_i32_1 = arith.constant 0 : i32
    return %c0_i32, %c0_i32_0 : i32, i32
  }
  func.func @transform_6(%arg0: i32) -> (i32, i32) {
    %c0_i32 = arith.constant 0 : i32
    %c0_i32_0 = arith.constant 0 : i32
    return %c0_i32, %arg0 : i32, i32
  }
  func.func @transform_7(%arg0: i32) -> (i32, i32, i32) {
    %c0_i32 = arith.constant 0 : i32
    %c0_i32_0 = arith.constant 0 : i32
    %c0_i32_1 = arith.constant 0 : i32
    return %arg0, %c0_i32, %c0_i32_0 : i32, i32, i32
  }
  func.func @transform_8(%arg0: i32) -> (i32, i32, i32) {
    %c0_i32 = arith.constant 0 : i32
    %c0_i32_0 = arith.constant 0 : i32
    %c0_i32_1 = arith.constant 0 : i32
    return %arg0, %c0_i32, %c0_i32_0 : i32, i32, i32
  }
}

module attributes {stable_mosaic.version = 11 : i64} {
  func.func @kernel(%arg0: i32, %arg1: memref<4x512xbf16, #tpu.memory_space<vmem>>, %arg2: memref<16x4xbf16, #tpu.memory_space<vmem>>, %arg3: memref<4x1xf32, #tpu.memory_space<vmem>>, %arg4: memref<4x1xf32, #tpu.memory_space<vmem>>, %arg5: memref<16x512xbf16, #tpu.memory_space<vmem>>, %arg6: memref<1x16x1xf32, #tpu.memory_space<vmem>>, %arg7: memref<1x16x1xf32, #tpu.memory_space<vmem>>) attributes {dimension_semantics = [#tpu.dimension_semantics<parallel>], iteration_bounds = array<i64: 2>, scalar_prefetch = 0 : i64, scratch_operands = 0 : i64, tpu.core_type = #tpu.core_type<tc>, window_params = [{transform_indices = @transform_0, window_bounds = array<i64: 4, 512>}, {pipeline_mode = #tpu.pipeline_mode<synchronous>, transform_indices = @transform_1, window_bounds = array<i64: 16, 4>}, {pipeline_mode = #tpu.pipeline_mode<synchronous>, transform_indices = @transform_2, window_bounds = array<i64: 4, 1>}, {pipeline_mode = #tpu.pipeline_mode<synchronous>, transform_indices = @transform_3, window_bounds = array<i64: 4, 1>}, {transform_indices = @transform_4, window_bounds = array<i64: 16, 512>}, {transform_indices = @transform_5, window_bounds = array<i64: 1, 16, 1>}, {transform_indices = @transform_6, window_bounds = array<i64: 1, 16, 1>}]} {
    %c0 = arith.constant 0 : index
    %c0_0 = arith.constant 0 : index
    %0 = vector.load %arg1[%c0, %c0_0] : memref<4x512xbf16, #tpu.memory_space<vmem>>, vector<4x512xbf16>
    %1 = arith.extf %0 : vector<4x512xbf16> to vector<4x512xf32>
    %c0_1 = arith.constant 0 : index
    %c0_2 = arith.constant 0 : index
    %2 = vector.load %arg3[%c0_1, %c0_2] : memref<4x1xf32, #tpu.memory_space<vmem>>, vector<4x1xf32>
    %3 = vector.broadcast %2 : vector<4x1xf32> to vector<4x512xf32>
    %4 = arith.mulf %1, %3 : vector<4x512xf32>
    %c0_3 = arith.constant 0 : index
    %c0_4 = arith.constant 0 : index
    %5 = vector.load %arg4[%c0_3, %c0_4] : memref<4x1xf32, #tpu.memory_space<vmem>>, vector<4x1xf32>
    %6 = vector.broadcast %5 : vector<4x1xf32> to vector<4x512xf32>
    %7 = arith.addf %4, %6 : vector<4x512xf32>
    %cst = arith.constant 0.000000e+00 : f32
    %8 = vector.broadcast %cst : f32 to vector<4x512xf32>
    %9 = arith.maximumf %7, %8 : vector<4x512xf32>
    %c0_5 = arith.constant 0 : index
    %c0_6 = arith.constant 0 : index
    %10 = vector.load %arg2[%c0_5, %c0_6] : memref<16x4xbf16, #tpu.memory_space<vmem>>, vector<16x4xbf16>
    %11 = arith.truncf %9 : vector<4x512xf32> to vector<4x512xbf16>
    %cst_7 = arith.constant dense<0.000000e+00> : vector<16x512xf32>
    %12 = tpu.matmul %10, %11, %cst_7 {dimension_numbers = #tpu.dot_dimension_numbers<[1], [0], [0], [1], [0, 0, 1, 1], [], []>} : vector<16x4xbf16>, vector<4x512xbf16>, vector<16x512xf32> -> vector<16x512xf32>
    %13 = arith.truncf %12 : vector<16x512xf32> to vector<16x512xbf16>
    %c0_8 = arith.constant 0 : index
    %c0_9 = arith.constant 0 : index
    %14 = vector.load %arg5[%c0_8, %c0_9] : memref<16x512xbf16, #tpu.memory_space<vmem>>, vector<16x512xbf16>
    tpu.vector_store %arg5[%c0_8, %c0_9], %13 {strides = array<i32>} : memref<16x512xbf16, #tpu.memory_space<vmem>>, vector<16x512xbf16>,
    %cst_10 = arith.constant dense<0.000000e+00> : vector<16xf32>
    %15 = vector.multi_reduction <add>, %12, %cst_10 [1] : vector<16x512xf32> to vector<16xf32>
    %16 = vector.shape_cast %15 : vector<16xf32> to vector<16x1xf32>
    %c0_11 = arith.constant 0 : index
    %c0_12 = arith.constant 0 : index
    %c0_13 = arith.constant 0 : index
    %17 = vector.load %arg6[%c0_11, %c0_12, %c0_13] : memref<1x16x1xf32, #tpu.memory_space<vmem>>, vector<1x16x1xf32>
    %18 = vector.shape_cast %17 : vector<1x16x1xf32> to vector<16x1xf32>
    %19 = vector.shape_cast %16 : vector<16x1xf32> to vector<1x16x1xf32>
    tpu.vector_store %arg6[%c0_11, %c0_12, %c0_13], %19 {strides = array<i32>} : memref<1x16x1xf32, #tpu.memory_space<vmem>>, vector<1x16x1xf32>,
    %20 = arith.mulf %12, %12 : vector<16x512xf32>
    %cst_14 = arith.constant dense<0.000000e+00> : vector<16xf32>
    %21 = vector.multi_reduction <add>, %20, %cst_14 [1] : vector<16x512xf32> to vector<16xf32>
    %22 = vector.shape_cast %21 : vector<16xf32> to vector<16x1xf32>
    %c0_15 = arith.constant 0 : index
    %c0_16 = arith.constant 0 : index
    %c0_17 = arith.constant 0 : index
    %23 = vector.load %arg7[%c0_15, %c0_16, %c0_17] : memref<1x16x1xf32, #tpu.memory_space<vmem>>, vector<1x16x1xf32>
    %24 = vector.shape_cast %23 : vector<1x16x1xf32> to vector<16x1xf32>
    %25 = vector.shape_cast %22 : vector<16x1xf32> to vector<1x16x1xf32>
    tpu.vector_store %arg7[%c0_15, %c0_16, %c0_17], %25 {strides = array<i32>} : memref<1x16x1xf32, #tpu.memory_space<vmem>>, vector<1x16x1xf32>,
    return
  }
  func.func @transform_0(%arg0: i32) -> (i32, i32) {
    %c0_i32 = arith.constant 0 : i32
    %c0_i32_0 = arith.constant 0 : i32
    return %c0_i32, %arg0 : i32, i32
  }
  func.func @transform_1(%arg0: i32) -> (i32, i32) {
    %c0_i32 = arith.constant 0 : i32
    %c0_i32_0 = arith.constant 0 : i32
    %c0_i32_1 = arith.constant 0 : i32
    return %c0_i32, %c0_i32_0 : i32, i32
  }
  func.func @transform_2(%arg0: i32) -> (i32, i32) {
    %c0_i32 = arith.constant 0 : i32
    %c0_i32_0 = arith.constant 0 : i32
    %c0_i32_1 = arith.constant 0 : i32
    return %c0_i32, %c0_i32_0 : i32, i32
  }
  func.func @transform_3(%arg0: i32) -> (i32, i32) {
    %c0_i32 = arith.constant 0 : i32
    %c0_i32_0 = arith.constant 0 : i32
    %c0_i32_1 = arith.constant 0 : i32
    return %c0_i32, %c0_i32_0 : i32, i32
  }
  func.func @transform_4(%arg0: i32) -> (i32, i32) {
    %c0_i32 = arith.constant 0 : i32
    %c0_i32_0 = arith.constant 0 : i32
    return %c0_i32, %arg0 : i32, i32
  }
  func.func @transform_5(%arg0: i32) -> (i32, i32, i32) {
    %c0_i32 = arith.constant 0 : i32
    %c0_i32_0 = arith.constant 0 : i32
    %c0_i32_1 = arith.constant 0 : i32
    return %arg0, %c0_i32, %c0_i32_0 : i32, i32, i32
  }
  func.func @transform_6(%arg0: i32) -> (i32, i32, i32) {
    %c0_i32 = arith.constant 0 : i32
    %c0_i32_0 = arith.constant 0 : i32
    %c0_i32_1 = arith.constant 0 : i32
    return %arg0, %c0_i32, %c0_i32_0 : i32, i32, i32
  }
}

module attributes {stable_mosaic.version = 11 : i64} {
  func.func @_bn_relu_kernel(%arg0: i32, %arg1: memref<16x512xbf16, #tpu.memory_space<vmem>>, %arg2: memref<16x1xf32, #tpu.memory_space<vmem>>, %arg3: memref<16x1xf32, #tpu.memory_space<vmem>>, %arg4: memref<16x512xf32, #tpu.memory_space<vmem>>) attributes {dimension_semantics = [#tpu.dimension_semantics<parallel>], iteration_bounds = array<i64: 2>, scalar_prefetch = 0 : i64, scratch_operands = 0 : i64, tpu.core_type = #tpu.core_type<tc>, window_params = [{transform_indices = @transform_0, window_bounds = array<i64: 16, 512>}, {pipeline_mode = #tpu.pipeline_mode<synchronous>, transform_indices = @transform_1, window_bounds = array<i64: 16, 1>}, {pipeline_mode = #tpu.pipeline_mode<synchronous>, transform_indices = @transform_2, window_bounds = array<i64: 16, 1>}, {transform_indices = @transform_3, window_bounds = array<i64: 16, 512>}]} {
    %c0 = arith.constant 0 : index
    %c0_0 = arith.constant 0 : index
    %0 = vector.load %arg1[%c0, %c0_0] : memref<16x512xbf16, #tpu.memory_space<vmem>>, vector<16x512xbf16>
    %1 = arith.extf %0 : vector<16x512xbf16> to vector<16x512xf32>
    %c0_1 = arith.constant 0 : index
    %c0_2 = arith.constant 0 : index
    %2 = vector.load %arg2[%c0_1, %c0_2] : memref<16x1xf32, #tpu.memory_space<vmem>>, vector<16x1xf32>
    %3 = vector.broadcast %2 : vector<16x1xf32> to vector<16x512xf32>
    %4 = arith.mulf %1, %3 : vector<16x512xf32>
    %c0_3 = arith.constant 0 : index
    %c0_4 = arith.constant 0 : index
    %5 = vector.load %arg3[%c0_3, %c0_4] : memref<16x1xf32, #tpu.memory_space<vmem>>, vector<16x1xf32>
    %6 = vector.broadcast %5 : vector<16x1xf32> to vector<16x512xf32>
    %7 = arith.addf %4, %6 : vector<16x512xf32>
    %cst = arith.constant 0.000000e+00 : f32
    %8 = vector.broadcast %cst : f32 to vector<16x512xf32>
    %9 = arith.maximumf %7, %8 : vector<16x512xf32>
    %c0_5 = arith.constant 0 : index
    %c0_6 = arith.constant 0 : index
    %10 = vector.load %arg4[%c0_5, %c0_6] : memref<16x512xf32, #tpu.memory_space<vmem>>, vector<16x512xf32>
    tpu.vector_store %arg4[%c0_5, %c0_6], %9 {strides = array<i32>} : memref<16x512xf32, #tpu.memory_space<vmem>>, vector<16x512xf32>,
    return
  }
  func.func @transform_0(%arg0: i32) -> (i32, i32) {
    %c0_i32 = arith.constant 0 : i32
    %c0_i32_0 = arith.constant 0 : i32
    return %c0_i32, %arg0 : i32, i32
  }
  func.func @transform_1(%arg0: i32) -> (i32, i32) {
    %c0_i32 = arith.constant 0 : i32
    %c0_i32_0 = arith.constant 0 : i32
    %c0_i32_1 = arith.constant 0 : i32
    return %c0_i32, %c0_i32_0 : i32, i32
  }
  func.func @transform_2(%arg0: i32) -> (i32, i32) {
    %c0_i32 = arith.constant 0 : i32
    %c0_i32_0 = arith.constant 0 : i32
    %c0_i32_1 = arith.constant 0 : i32
    return %c0_i32, %c0_i32_0 : i32, i32
  }
  func.func @transform_3(%arg0: i32) -> (i32, i32) {
    %c0_i32 = arith.constant 0 : i32
    %c0_i32_0 = arith.constant 0 : i32
    return %c0_i32, %arg0 : i32, i32
  }
}

</mosaic_0001>

<bundles_post_ra>
// kernel: small_block_forward.5
= control target key start
LH: loop header
LB: loop body
LE: loop exit
PB: predicated region body
PF: predicated region fallthrough
CT: control target
= control target key end

     0   :  { %s572_s15 = smov 0   ;;  %s615_s0 = inlined_call_operand.vmem [shape: f32[4,1024], index: 0, kind: input, shape index: {}]   ;;  %s616_s1 = inlined_call_operand.vmem [shape: bf16[4,4], index: 1, kind: input, shape index: {}]   ;;  %s617_s2 = inlined_call_operand.vmem [shape: bf16[4,1024], index: 2, kind: output, shape index: {0}]   ;;  %s618_s3 = inlined_call_operand.vmem [shape: f32[2,4,1], index: 3, kind: output, shape index: {1}]   ;;  %s619_s4 = inlined_call_operand.vmem [shape: f32[2,4,1], index: 4, kind: output, shape index: {2}]  }
   0x1 LB: > { %s578_s16 = sadd.s32 4294967295, %s543_s15   ;;  %p510_p0 = scmp.ge.s32.totalorder %s543_s15, 1  ;;  %s543_s15 = sphi %s572_s15, %s15_s15  }
   0x2   : > { %p168_p1 = scmp.lt.s32.totalorder %s543_s15, 3 }
   0x4   : > { %p169_p2 = pnand %p510_p0, %p168_p1 }
   0x5   : > { %s511_s17 = sshll.u32 (!%p169_p2), %s578_s16, 2  ;;  %p214_p4 = scmp.lt.s32.totalorder (!%p169_p2), %s578_s16, 1 }
   0x6   : > { %172 = sbr.rel (%p169_p2) target bundleno = 368 (0x170), region = 28  ;;  %p203_p3 = scmp.lt.s32.totalorder (!%p169_p2), %s511_s17, 7 }
   0xb   : > { %v545_v0 = vmov 0   ;;  %s621_s17 = smov (!%p203_p3, %s511_s17), 7  ;;  %vm240_vm0 = vcmask 1041408   ;;  %v225_v11 = vld [vmem:[%s616_s1] sm:$0x3]  ;;  %vm236_vm1 = vcmask 31744   ;;  %v348_v14 = vlaneseq }
   0xc   : > { %285 = vmatprep.mubr.bf16.mxu0 %v545_v0  ;;  %326 = vmatprep.mubr.bf16.mxu1 %v545_v0  ;;  %s512_s18 = sshll.u32 %s621_s17, 2  ;;  %v546_v12 = vmov 1983009808   ;;  %vm362_vm2 = vcmask 1043456   ;;  %s514_s24 = sshll.u32 %s621_s17, 1  ;;  %vm372_vm3 = vcmask 3072  }
   0xd   : > { %s206_s21 = scalar_lea.vmem %s615_s0, %s512_s18  ;;  %v346_v13 = vunpack.c.l.s4 %v546_v12  ;;  %v349_v16 = vshrl.u32 %v348_v14, 7  ;;  %s212_s27 = scalar_lea.vmem %s617_s2, %s514_s24 }
   0xe   : > { %v223_v1 = vld [vmem:[%s206_s21] sm:$0xff]  ;;  %v224_v2 = vld [vmem:[%s206_s21 + $0x8] sm:$0xff]  ;;  %s623_s16 = smov (!%p214_p4, %s578_s16), 1 }
   0xf   : > { %v228_v3 = vcombine.high %v223_v1, %v223_v1  ;;  %v229_v4 = vcombine.high %v224_v2, %v224_v2  ;;  %v232_v5 = vpack.c.bf16 %v223_v1, %v223_v1  ;;  %v234_v6 = vpack.c.bf16 %v224_v2, %v224_v2  ;;  %s515_s28 = sshll.u32 %s623_s16, 2 }
  0x10   : > { %v347_v15 = vunpack.c.0.s8 %v346_v13  ;;  %s217_s5 = scalar_lea.vmem %s618_s3, %s515_s28  ;;  %s221_s8 = scalar_lea.vmem %s619_s4, %s515_s28 }
  0x11   : > { %v233_v7 = vpack.c.bf16 %v228_v3, %v228_v3  ;;  %v235_v8 = vpack.c.bf16 %v229_v4, %v229_v4  ;;  %v242_v9 = vsel %vm240_vm0, %v232_v5, 0  ;;  %v248_v10 = vsel %vm240_vm0, %v234_v6, 0 }
  0x12   : > { %v350_v21 = vsub.s32 %v347_v15, %v349_v16 }
  0x13   : > { %517 = vmatprep.subr.msk.bf16.mxu0 %vm240_vm0, %v233_v7  ;;  %519 = vmatprep.subr.msk.bf16.mxu1 %vm240_vm0, %v235_v8 }
  0x14   : > { %268 = vmatpush1.bf16.msra.mxu0 %v242_v9  ;;  %309 = vmatpush1.bf16.msra.mxu1 %v248_v10 }
  0x17   : > { %518 = vmatmul.mubr.msk.bf16.vlgmr.msra.gmra.mxu0 %vm236_vm1, %v225_v11  ;;  %520 = vmatmul.mubr.msk.bf16.vlgmr.msra.gmra.mxu1 %vm236_vm1, %v225_v11 }
  0xd7   : > { %v287_v17 = vpop.f32.mrf.mxu0  ;;  %v328_v18 = vpop.f32.mrf.mxu1 }
  0xd8   : > { %v374_v19 = vmul.f32 %v287_v17, %v287_v17  ;;  %v376_v20 = vmul.f32 %v328_v18, %v328_v18  ;;  %v363_v22 = vsel %vm362_vm2, %v287_v17, 0.0  ;;  %v366_v28 = vsel %vm362_vm2, %v328_v18, 0.0 }
  0xd9   : > { %v289_v23 = vpop.f32.mrf.mxu0  ;;  %v330_v24 = vpop.f32.mrf.mxu1 }
  0xda   : > { %v521_v25 = vpack.c.bf16 %v289_v23, %v287_v17  ;;  %v364_v26 = vsel %vm362_vm2, %v289_v23, 0.0  ;;  %v375_v27 = vmul.f32 %v289_v23, %v289_v23  ;;  %v522_v29 = vpack.c.bf16 %v330_v24, %v328_v18 }
  0xdb   : > { %v291_v30 = vpop.f32.mrf.mxu0  ;;  %v332_v31 = vpop.f32.mrf.mxu1  ;;  %v365_v32 = vadd.f32 %v364_v26, %v363_v22  ;;  %v378_v33 = vsel %vm362_vm2, %v374_v19, 0.0  ;;  %v381_v36 = vsel %vm362_vm2, %v376_v20, 0.0  ;;  %v377_v42 = vmul.f32 %v330_v24, %v330_v24 }
  0xdc   : > { %v351_v34 = vrot.slane %v521_v25, %v350_v21  ;;  %v379_v35 = vsel %vm362_vm2, %v375_v27, 0.0  ;;  %v358_v37 = vrot.slane %v522_v29, %v350_v21  ;;  %v368_v43 = vsel %vm362_vm2, %v330_v24, 0.0 }
  0xdd   : > { %v292_v38 = vpop.f32.mrf.mxu0  ;;  %v333_v39 = vpop.f32.mrf.mxu1  ;;  %v367_v40 = vadd.f32 %v366_v28, %v365_v32  ;;  %v380_v41 = vadd.f32 %v379_v35, %v378_v33  ;;  %v383_v47 = vsel %vm362_vm2, %v377_v42, 0.0 }
  0xde   : > { %v359_v44 = vcombine.low %v351_v34, %v358_v37 }
  0xdf   : > { %v369_v45 = vadd.f32 %v368_v43, %v367_v40  ;;  %v382_v46 = vadd.f32 %v381_v36, %v380_v41 }
  0xe0   : > { %361 = vst [vmem:[%s212_s27] sm:$0xff] %v359_v44 }
  0xe1   : > { %370 = vadd.xlane.f32.xlu0 %v369_v45  ;;  %v384_v48 = vadd.f32 %v383_v47, %v382_v46 }
  0xe5   : > { %385 = vadd.xlane.f32.xlu0 %v384_v48 }
 0x16a   : > { %v371_v49 = vpop.xlane.xlu0 %370 }
 0x16b   : > { %373 = vst.msk [vmem:[%s217_s5] sm:$0xf] %vm372_vm3, %v371_v49 }
 0x16e   : > { %v386_v50 = vpop.xlane.xlu0 %385 }
 0x16f   : > { %387 = vst.msk [vmem:[%s221_s8] sm:$0xf] %vm372_vm3, %v386_v50 }
 0x170 PF: > { %s15_s15 = sadd.s32 1, %s543_s15  }
 0x171   : > { %p12_p5 = scmp.ge.s32.totalorder %s15_s15, 4  }
 0x173   :  { %14 = sbr.rel (!%p12_p5) target bundleno = 1 (0x1), region = 82 }

// kernel: small_block_forward.7
= control target key start
LH: loop header
LB: loop body
LE: loop exit
PB: predicated region body
PF: predicated region fallthrough
CT: control target
= control target key end

     0   :  { %s1038_s27 = smov 0   ;;  %s1143_s0 = inlined_call_operand.vmem [shape: bf16[4,1024], index: 0, kind: input, shape index: {}]   ;;  %s1144_s1 = inlined_call_operand.vmem [shape: bf16[3,4,4], index: 1, kind: input, shape index: {}]   ;;  %s1145_s2 = inlined_call_operand.vmem [shape: f32[4,1], index: 2, kind: input, shape index: {}]   ;;  %s1146_s3 = inlined_call_operand.vmem [shape: f32[4,1], index: 3, kind: input, shape index: {}]   ;;  %s1147_s4 = inlined_call_operand.vmem [shape: f32[1,512], index: 4, kind: input, shape index: {}]   ;;  %s1148_s5 = inlined_call_operand.vmem [shape: f32[1,512], index: 5, kind: input, shape index: {}]   ;;  %s1149_s6 = inlined_call_operand.vmem [shape: bf16[4,1024], index: 6, kind: output, shape index: {0}]   ;;  %s1150_s7 = inlined_call_operand.vmem [shape: f32[2,4,1], index: 7, kind: output, shape index: {1}]   ;;  %s1151_s8 = inlined_call_operand.vmem [shape: f32[2,4,1], index: 8, kind: output, shape index: {2}]  }
   0x1 LB: > { %s1044_s28 = sadd.s32 4294967295, %s986_s27   ;;  %p941_p0 = scmp.ge.s32.totalorder %s986_s27, 1  ;;  %s986_s27 = sphi %s1038_s27, %s19_s27  }
   0x2   : > { %p268_p1 = scmp.lt.s32.totalorder %s986_s27, 3 }
   0x4   : > { %p269_p2 = pnand %p941_p0, %p268_p1 }
   0x5   : > { %s942_s11 = sshll.u32 (!%p269_p2), %s1044_s28, 2  ;;  %s990_s16 = smov (!%p269_p2), 1  }
   0x6   : > { %272 = sbr.rel (%p269_p2) target bundleno = 628 (0x274), region = 44  ;;  %p311_p3 = scmp.lt.s32.totalorder (!%p269_p2), %s942_s11, 7 }
   0x7   : > { %s991_s17 = smov (!%p269_p2), 127   ;;  %p322_p4 = scmp.lt.s32.totalorder (!%p269_p2), %s1044_s28, 1 }
   0xb   : > { %v334_v0 = vld [vmem:[%s1145_s2] sm:$0xf]  ;;  %v988_v1 = vmov 0   ;;  %s1153_s11 = smov (!%p311_p3, %s942_s11), 7  ;;  %v989_v3 = vmov 839922192   ;;  %v342_v5 = vlaneseq }
   0xc   : > { %979 = vset.pattern.permute.xlu0 %v988_v1  ;;  %512 = vmatprep.mubr.bf16.mxu0 %v988_v1  ;;  %v349_v2 = vld [vmem:[%s1146_s3] sm:$0xf]  ;;  %v340_v4 = vunpack.c.l.s4 %v989_v3  ;;  %s943_s12 = sshll.u32 %s1153_s11, 1  ;;  %vm467_vm0 = vcmask 1041408   ;;  %vm463_vm1 = vcmask 31744   ;;  %vm793_vm4 = vcmask 1043456  }
   0xd   : > { %337 = vperm.xlu0 %979, %v334_v0   ;;  %553 = vmatprep.mubr.bf16.mxu1 %v988_v1  ;;  %v1061_v7 = vshrl.u32 %v342_v5, 7  ;;  %s314_s15 = scalar_lea.vmem %s1143_s0, %s943_s12  ;;  %v948_v30 = vld [vmem:[%s1144_s1 + $0x2] sm:$0x3]  ;;  %v381_v31 = vand.u32 127, %v342_v5  ;;  %v452_v60 = vld [vmem:[%s1144_s1] sm:$0x3]  ;;  %s320_s10 = scalar_lea.vmem %s1149_s6, %s943_s12 }
   0xe   : > { %v341_v6 = vunpack.c.0.s8 %v340_v4  ;;  %v331_v9 = vld [vmem:[%s314_s15] sm:$0xff]  ;;  %s1155_s28 = smov (!%p322_p4, %s1044_s28), 1  ;;  %vm803_vm5 = vcmask 3072  }
   0xf   : > { %v332_v11 = vunpack.c.l.bf16 %v331_v9  ;;  %v333_v12 = vunpack.c.h.bf16 %v331_v9  ;;  %v391_v32 = vsub.s32 0, %v1061_v7  ;;  %v387_v33 = vld [vmem:[%s1147_s4] sm:$0xf]  ;;  %v395_v34 = vsub.s32 1, %v1061_v7  ;;  %s946_s13 = sshll.u32 %s1155_s28, 2 }
  0x10   : > { %v344_v8 = vsub.s32 %v341_v6, %v1061_v7  ;;  %vm382_vm2 = vcmp.lt.s32.totalorder %v381_v31, 1  ;;  %v399_v39 = vsub.s32 2, %v1061_v7  ;;  %v403_v40 = vsub.s32 3, %v1061_v7  ;;  %v426_v50 = vld [vmem:[%s1148_s5] sm:$0xf]  ;;  %s329_s18 = scalar_lea.vmem %s1151_s8, %s946_s13 }
  0x11   : > { %352 = vperm.xlu0 %979, %v349_v2   ;;  %v392_v36 = vrot.slane %v387_v33, %v391_v32  ;;  %v396_v38 = vrot.slane %v387_v33, %v395_v34  ;;  %vm421_vm3 = vcmp.lt.s32.totalorder %v381_v31, 127  ;;  %v431_v55 = vrot.slane %v426_v50, %v391_v32 }
  0x12   : > { %v400_v48 = vrot.slane %v387_v33, %v399_v39  ;;  %v404_v49 = vrot.slane %v387_v33, %v403_v40  ;;  %v435_v59 = vrot.slane %v426_v50, %v395_v34  ;;  %v439_v4 = vrot.slane %v426_v50, %v399_v39 }
  0x13   : > { %v443_v9 = vrot.slane %v426_v50, %v403_v40 }
  0x88   : > { %v338_v10 = vpop.permute.xlu0 %337 }
  0x89   : > { %v345_v13 = vrot.slane %v338_v10, %v344_v8 }
  0x8b   : > { %v347_v15 = vmul.f32 %v345_v13, %v332_v11  ;;  %v348_v16 = vmul.f32 %v345_v13, %v333_v12 }
  0x8c   : > { %v353_v14 = vpop.permute.xlu0 %352 }
  0x8d   : > { %v360_v17 = vrot.slane %v353_v14, %v344_v8 }
  0x8f   : > { %v362_v18 = vadd.f32 %v360_v17, %v347_v15  ;;  %v363_v19 = vadd.f32 %v360_v17, %v348_v16 }
  0x91   : > { %v364_v20 = vmax.f32 %v362_v18, 0.0  ;;  %v365_v21 = vmax.f32 %v363_v19, 0.0  ;;  %v957_v18 = vld [vmem:[%s1144_s1 + $0x4] sm:$0x3] }
  0x93   : > { %372 = vrot.lane.b32.xlu1 %v364_v20, %s990_s16  ;;  %v369_v22 = vcombine.high %v365_v21, %v365_v21  ;;  %v368_v23 = vcombine.high %v364_v20, %v364_v20  ;;  %v461_v24 = vpack.c.bf16 %v365_v21, %v365_v21  ;;  %v459_v25 = vpack.c.bf16 %v364_v20, %v364_v20 }
  0x95   : > { %378 = vrot.lane.b32.xlu0 %v369_v22, %s990_s16  ;;  %v462_v26 = vpack.c.bf16 %v369_v22, %v369_v22  ;;  %v460_v27 = vpack.c.bf16 %v368_v23, %v368_v23  ;;  %v475_v28 = vsel %vm467_vm0, %v461_v24, 0  ;;  %v469_v29 = vsel %vm467_vm0, %v459_v25, 0 }
  0x97   : > { %951 = vmatprep.subr.msk.bf16.mxu1 %vm467_vm0, %v462_v26  ;;  %374 = vrot.lane.b32.xlu1 %v368_v23, %s990_s16 }
  0x98   : > { %949 = vmatprep.subr.msk.bf16.mxu0 %vm467_vm0, %v460_v27  ;;  %536 = vmatpush1.bf16.msra.mxu1 %v475_v28 }
  0x99   : > { %495 = vmatpush1.bf16.msra.mxu0 %v469_v29  ;;  %413 = vrot.lane.b32.xlu0 %v364_v20, %s991_s17 }
  0x9b   : > { %376 = vrot.lane.b32.xlu1 %v365_v21, %s990_s16  ;;  %952 = vmatmul.mubr.msk.bf16.vlgmr.msra.gmra.mxu1 %vm463_vm1, %v948_v30  ;;  %s325_s16 = scalar_lea.vmem %s1150_s7, %s946_s13 }
  0x9c   : > { %950 = vmatmul.mubr.msk.bf16.vlgmr.msra.gmra.mxu0 %vm463_vm1, %v948_v30  ;;  %650 = vmatprep.mubr.bf16.mxu1 %v988_v1 }
  0x9d   : > { %417 = vrot.lane.b32.xlu0 %v365_v21, %s991_s17  ;;  %609 = vmatprep.mubr.bf16.mxu0 %v988_v1 }
  0x9f   : > { %415 = vrot.lane.b32.xlu1 %v368_v23, %s991_s17 }
  0xa3   : > { %419 = vrot.lane.b32.xlu1 %v369_v22, %s991_s17 }
 0x105   : > { %v373_v35 = vpop.permute.xlu1 %372 }
 0x107   : > { %v379_v37 = vpop.permute.xlu0 %378 }
 0x108   : > { %v386_v41 = vsel %vm382_vm2, %v379_v37, %v373_v35 }
 0x109   : > { %v409_v42 = vmul.f32 %v392_v36, %v386_v41  ;;  %v375_v43 = vpop.permute.xlu1 %374 }
 0x10a   : > { %v385_v44 = vsel %vm382_vm2, %v373_v35, %v375_v43  ;;  %v992_v35 = vmov 1983009808  }
 0x10b   : > { %v453_v45 = vpack.c.bf16 %v409_v42, %v409_v42  ;;  %v410_v46 = vmul.f32 %v396_v38, %v385_v44  ;;  %v414_v47 = vpop.permute.xlu0 %413  ;;  %v777_v36 = vunpack.c.l.s4 %v992_v35 }
 0x10d   : > { %v454_v51 = vpack.c.bf16 %v410_v46, %v410_v46  ;;  %v377_v52 = vpop.permute.xlu1 %376  ;;  %v566_v58 = vsel %vm467_vm0, %v453_v45, 0  ;;  %v778_v44 = vunpack.c.0.s8 %v777_v36 }
 0x10e   : > { %v383_v53 = vsel %vm382_vm2, %v377_v52, %v379_v37  ;;  %v384_v54 = vsel %vm382_vm2, %v375_v43, %v377_v52 }
 0x10f   : > { %v411_v56 = vmul.f32 %v400_v48, %v384_v54  ;;  %v412_v57 = vmul.f32 %v404_v49, %v383_v53  ;;  %953 = vmatprep.subr.msk.bf16.mxu0 %vm467_vm0, %v454_v51  ;;  %v418_v63 = vpop.permute.xlu0 %417 }
 0x110   : > { %592 = vmatpush1.bf16.msra.mxu0 %v566_v58 }
 0x111   : > { %v455_v61 = vpack.c.bf16 %v411_v56, %v411_v56  ;;  %v456_v62 = vpack.c.bf16 %v412_v57, %v412_v57  ;;  %v416_v0 = vpop.permute.xlu1 %415 }
 0x112   : > { %v423_v2 = vsel %vm421_vm3, %v416_v0, %v418_v63  ;;  %v424_v3 = vsel %vm421_vm3, %v414_v47, %v416_v0 }
 0x113   : > { %v448_v5 = vmul.f32 %v431_v55, %v424_v3  ;;  %v449_v6 = vmul.f32 %v435_v59, %v423_v2  ;;  %954 = vmatmul.mubr.msk.bf16.vlgmr.msra.gmra.mxu0 %vm463_vm1, %v452_v60  ;;  %955 = vmatprep.subr.msk.bf16.mxu1 %vm467_vm0, %v456_v62  ;;  %v572_v8 = vsel %vm467_vm0, %v455_v61, 0  ;;  %v781_v55 = vsub.s32 %v778_v44, %v1061_v7 }
 0x114   : > { %633 = vmatpush1.bf16.msra.mxu1 %v572_v8  ;;  %712 = vmatprep.mubr.bf16.mxu0 %v988_v1 }
 0x115   : > { %v661_v10 = vpack.c.bf16 %v448_v5, %v448_v5  ;;  %v662_v11 = vpack.c.bf16 %v449_v6, %v449_v6  ;;  %v420_v12 = vpop.permute.xlu1 %419 }
 0x116   : > { %v422_v13 = vsel %vm421_vm3, %v418_v63, %v420_v12  ;;  %v425_v14 = vsel %vm421_vm3, %v420_v12, %v414_v47 }
 0x117   : > { %v450_v15 = vmul.f32 %v439_v4, %v422_v13  ;;  %v451_v16 = vmul.f32 %v443_v9, %v425_v14  ;;  %956 = vmatmul.mubr.msk.bf16.vlgmr.msra.gmra.mxu1 %vm463_vm1, %v452_v60  ;;  %958 = vmatprep.subr.msk.bf16.mxu0 %vm467_vm0, %v662_v11  ;;  %v669_v17 = vsel %vm467_vm0, %v661_v10, 0 }
 0x118   : > { %695 = vmatpush1.bf16.msra.mxu0 %v669_v17  ;;  %753 = vmatprep.mubr.bf16.mxu1 %v988_v1 }
 0x119   : > { %v663_v19 = vpack.c.bf16 %v450_v15, %v450_v15  ;;  %v664_v20 = vpack.c.bf16 %v451_v16, %v451_v16 }
 0x11b   : > { %959 = vmatmul.mubr.msk.bf16.vlgmr.msra.gmra.mxu0 %vm463_vm1, %v957_v18  ;;  %960 = vmatprep.subr.msk.bf16.mxu1 %vm467_vm0, %v664_v20  ;;  %v675_v21 = vsel %vm467_vm0, %v663_v19, 0 }
 0x11c   : > { %736 = vmatpush1.bf16.msra.mxu1 %v675_v21 }
 0x11f   : > { %961 = vmatmul.mubr.msk.bf16.vlgmr.msra.gmra.mxu1 %vm463_vm1, %v957_v18 }
 0x15b   : > { %v555_v22 = vpop.f32.mrf.mxu1 }
 0x15c   : > { %v514_v23 = vpop.f32.mrf.mxu0 }
 0x15d   : > { %v557_v24 = vpop.f32.mrf.mxu1 }
 0x15e   : > { %v516_v25 = vpop.f32.mrf.mxu0 }
 0x15f   : > { %v559_v26 = vpop.f32.mrf.mxu1 }
 0x160   : > { %v518_v27 = vpop.f32.mrf.mxu0 }
 0x161   : > { %v560_v28 = vpop.f32.mrf.mxu1 }
 0x162   : > { %v519_v29 = vpop.f32.mrf.mxu0 }
 0x1d3   : > { %v611_v1 = vpop.f32.mrf.mxu0 }
 0x1d4   : > { %v612_v37 = vadd.f32 %v611_v1, %v514_v23 }
 0x1d5   : > { %v613_v30 = vpop.f32.mrf.mxu0 }
 0x1d6   : > { %v614_v40 = vadd.f32 %v613_v30, %v516_v25 }
 0x1d7   : > { %v615_v31 = vpop.f32.mrf.mxu0  ;;  %v652_v32 = vpop.f32.mrf.mxu1 }
 0x1d8   : > { %v653_v45 = vadd.f32 %v652_v32, %v555_v22 }
 0x1d9   : > { %v616_v33 = vpop.f32.mrf.mxu0  ;;  %v654_v34 = vpop.f32.mrf.mxu1 }
 0x1da   : > { %v655_v47 = vadd.f32 %v654_v34, %v557_v24 }
 0x1db   : > { %v656_v38 = vpop.f32.mrf.mxu1  ;;  %v714_v39 = vpop.f32.mrf.mxu0 }
 0x1dc   : > { %v762_v41 = vadd.f32 %v714_v39, %v612_v37 }
 0x1dd   : > { %v657_v42 = vpop.f32.mrf.mxu1  ;;  %v716_v43 = vpop.f32.mrf.mxu0 }
 0x1de   : > { %v763_v46 = vadd.f32 %v716_v43, %v614_v40  ;;  %v805_v48 = vmul.f32 %v762_v41, %v762_v41  ;;  %v794_v51 = vsel %vm793_vm4, %v762_v41, 0.0 }
 0x1df   : > { %v718_v49 = vpop.f32.mrf.mxu0  ;;  %v755_v50 = vpop.f32.mrf.mxu1 }
 0x1e0   : > { %v795_v52 = vsel %vm793_vm4, %v763_v46, 0.0  ;;  %v806_v53 = vmul.f32 %v763_v46, %v763_v46  ;;  %v764_v54 = vadd.f32 %v755_v50, %v653_v45  ;;  %v962_v59 = vpack.c.bf16 %v763_v46, %v762_v41 }
 0x1e1   : > { %v719_v56 = vpop.f32.mrf.mxu0  ;;  %v757_v57 = vpop.f32.mrf.mxu1  ;;  %v796_v58 = vadd.f32 %v795_v52, %v794_v51  ;;  %v809_v2 = vsel %vm793_vm4, %v805_v48, 0.0 }
 0x1e2   : > { %v807_v60 = vmul.f32 %v764_v54, %v764_v54  ;;  %v765_v61 = vadd.f32 %v757_v57, %v655_v47  ;;  %v797_v62 = vsel %vm793_vm4, %v764_v54, 0.0  ;;  %v810_v3 = vsel %vm793_vm4, %v806_v53, 0.0 }
 0x1e3   : > { %v759_v63 = vpop.f32.mrf.mxu1  ;;  %v798_v0 = vadd.f32 %v797_v62, %v796_v58  ;;  %v811_v6 = vadd.f32 %v810_v3, %v809_v2  ;;  %v782_v11 = vrot.slane %v962_v59, %v781_v55 }
 0x1e4   : > { %v963_v4 = vpack.c.bf16 %v765_v61, %v764_v54  ;;  %v799_v5 = vsel %vm793_vm4, %v765_v61, 0.0  ;;  %v808_v7 = vmul.f32 %v765_v61, %v765_v61  ;;  %v812_v10 = vsel %vm793_vm4, %v807_v60, 0.0 }
 0x1e5   : > { %v760_v8 = vpop.f32.mrf.mxu1  ;;  %v800_v9 = vadd.f32 %v799_v5, %v798_v0  ;;  %v813_v13 = vadd.f32 %v812_v10, %v811_v6 }
 0x1e6   : > { %v789_v12 = vrot.slane %v963_v4, %v781_v55  ;;  %v814_v14 = vsel %vm793_vm4, %v808_v7, 0.0 }
 0x1e7   : > { %801 = vadd.xlane.f32.xlu0 %v800_v9  ;;  %v815_v16 = vadd.f32 %v814_v14, %v813_v13 }
 0x1e8   : > { %v790_v15 = vcombine.low %v782_v11, %v789_v12 }
 0x1e9   : > { %816 = vadd.xlane.f32.xlu1 %v815_v16 }
 0x1ea   : > { %792 = vst [vmem:[%s320_s10] sm:$0xff] %v790_v15 }
 0x270   : > { %v802_v17 = vpop.xlane.xlu0 %801 }
 0x271   : > { %804 = vst.msk [vmem:[%s325_s16] sm:$0xf] %vm803_vm5, %v802_v17 }
 0x272   : > { %v817_v18 = vpop.xlane.xlu1 %816 }
 0x273   : > { %818 = vst.msk [vmem:[%s329_s18] sm:$0xf] %vm803_vm5, %v817_v18 }
 0x274 PF: > { %s19_s27 = sadd.s32 1, %s986_s27  }
 0x275   : > { %p16_p5 = scmp.ge.s32.totalorder %s19_s27, 4  }
 0x277   :  { %18 = sbr.rel (!%p16_p5) target bundleno = 1 (0x1), region = 100 }

// kernel: small_block_forward.6
= control target key start
LH: loop header
LB: loop body
LE: loop exit
PB: predicated region body
PF: predicated region fallthrough
CT: control target
= control target key end

     0   :  { %s1038_s27 = smov 0   ;;  %s1143_s0 = inlined_call_operand.vmem [shape: bf16[4,1024], index: 0, kind: input, shape index: {}]   ;;  %s1144_s1 = inlined_call_operand.vmem [shape: bf16[3,4,4], index: 1, kind: input, shape index: {}]   ;;  %s1145_s2 = inlined_call_operand.vmem [shape: f32[4,1], index: 2, kind: input, shape index: {}]   ;;  %s1146_s3 = inlined_call_operand.vmem [shape: f32[4,1], index: 3, kind: input, shape index: {}]   ;;  %s1147_s4 = inlined_call_operand.vmem [shape: f32[1,512], index: 4, kind: input, shape index: {}]   ;;  %s1148_s5 = inlined_call_operand.vmem [shape: f32[1,512], index: 5, kind: input, shape index: {}]   ;;  %s1149_s6 = inlined_call_operand.vmem [shape: bf16[4,1024], index: 6, kind: output, shape index: {0}]   ;;  %s1150_s7 = inlined_call_operand.vmem [shape: f32[2,4,1], index: 7, kind: output, shape index: {1}]   ;;  %s1151_s8 = inlined_call_operand.vmem [shape: f32[2,4,1], index: 8, kind: output, shape index: {2}]  }
   0x1 LB: > { %s1044_s28 = sadd.s32 4294967295, %s986_s27   ;;  %p941_p0 = scmp.ge.s32.totalorder %s986_s27, 1  ;;  %s986_s27 = sphi %s1038_s27, %s19_s27  }
   0x2   : > { %p268_p1 = scmp.lt.s32.totalorder %s986_s27, 3 }
   0x4   : > { %p269_p2 = pnand %p941_p0, %p268_p1 }
   0x5   : > { %s942_s11 = sshll.u32 (!%p269_p2), %s1044_s28, 2  ;;  %s990_s16 = smov (!%p269_p2), 16  }
   0x6   : > { %272 = sbr.rel (%p269_p2) target bundleno = 628 (0x274), region = 44  ;;  %p311_p3 = scmp.lt.s32.totalorder (!%p269_p2), %s942_s11, 7 }
   0x7   : > { %s991_s17 = smov (!%p269_p2), 112   ;;  %p322_p4 = scmp.lt.s32.totalorder (!%p269_p2), %s1044_s28, 1 }
   0xb   : > { %v334_v0 = vld [vmem:[%s1145_s2] sm:$0xf]  ;;  %v988_v1 = vmov 0   ;;  %s1153_s11 = smov (!%p311_p3, %s942_s11), 7  ;;  %v989_v3 = vmov 839922192   ;;  %v342_v5 = vlaneseq }
   0xc   : > { %979 = vset.pattern.permute.xlu0 %v988_v1  ;;  %512 = vmatprep.mubr.bf16.mxu0 %v988_v1  ;;  %v349_v2 = vld [vmem:[%s1146_s3] sm:$0xf]  ;;  %v340_v4 = vunpack.c.l.s4 %v989_v3  ;;  %s943_s12 = sshll.u32 %s1153_s11, 1  ;;  %vm467_vm0 = vcmask 1041408   ;;  %vm463_vm1 = vcmask 31744   ;;  %vm793_vm4 = vcmask 1043456  }
   0xd   : > { %337 = vperm.xlu0 %979, %v334_v0   ;;  %553 = vmatprep.mubr.bf16.mxu1 %v988_v1  ;;  %v1061_v7 = vshrl.u32 %v342_v5, 7  ;;  %s314_s15 = scalar_lea.vmem %s1143_s0, %s943_s12  ;;  %v948_v30 = vld [vmem:[%s1144_s1 + $0x2] sm:$0x3]  ;;  %v381_v31 = vand.u32 127, %v342_v5  ;;  %v452_v60 = vld [vmem:[%s1144_s1] sm:$0x3]  ;;  %s320_s10 = scalar_lea.vmem %s1149_s6, %s943_s12 }
   0xe   : > { %v341_v6 = vunpack.c.0.s8 %v340_v4  ;;  %v331_v9 = vld [vmem:[%s314_s15] sm:$0xff]  ;;  %s1155_s28 = smov (!%p322_p4, %s1044_s28), 1  ;;  %vm803_vm5 = vcmask 3072  }
   0xf   : > { %v332_v11 = vunpack.c.l.bf16 %v331_v9  ;;  %v333_v12 = vunpack.c.h.bf16 %v331_v9  ;;  %v391_v32 = vsub.s32 0, %v1061_v7  ;;  %v387_v33 = vld [vmem:[%s1147_s4] sm:$0xf]  ;;  %v395_v34 = vsub.s32 1, %v1061_v7  ;;  %s946_s13 = sshll.u32 %s1155_s28, 2 }
  0x10   : > { %v344_v8 = vsub.s32 %v341_v6, %v1061_v7  ;;  %vm382_vm2 = vcmp.lt.s32.totalorder %v381_v31, 16  ;;  %v399_v39 = vsub.s32 2, %v1061_v7  ;;  %v403_v40 = vsub.s32 3, %v1061_v7  ;;  %v426_v50 = vld [vmem:[%s1148_s5] sm:$0xf]  ;;  %s329_s18 = scalar_lea.vmem %s1151_s8, %s946_s13 }
  0x11   : > { %352 = vperm.xlu0 %979, %v349_v2   ;;  %v392_v36 = vrot.slane %v387_v33, %v391_v32  ;;  %v396_v38 = vrot.slane %v387_v33, %v395_v34  ;;  %vm421_vm3 = vcmp.lt.s32.totalorder %v381_v31, 112  ;;  %v431_v55 = vrot.slane %v426_v50, %v391_v32 }
  0x12   : > { %v400_v48 = vrot.slane %v387_v33, %v399_v39  ;;  %v404_v49 = vrot.slane %v387_v33, %v403_v40  ;;  %v435_v59 = vrot.slane %v426_v50, %v395_v34  ;;  %v439_v4 = vrot.slane %v426_v50, %v399_v39 }
  0x13   : > { %v443_v9 = vrot.slane %v426_v50, %v403_v40 }
  0x88   : > { %v338_v10 = vpop.permute.xlu0 %337 }
  0x89   : > { %v345_v13 = vrot.slane %v338_v10, %v344_v8 }
  0x8b   : > { %v347_v15 = vmul.f32 %v345_v13, %v332_v11  ;;  %v348_v16 = vmul.f32 %v345_v13, %v333_v12 }
  0x8c   : > { %v353_v14 = vpop.permute.xlu0 %352 }
  0x8d   : > { %v360_v17 = vrot.slane %v353_v14, %v344_v8 }
  0x8f   : > { %v362_v18 = vadd.f32 %v360_v17, %v347_v15  ;;  %v363_v19 = vadd.f32 %v360_v17, %v348_v16 }
  0x91   : > { %v364_v20 = vmax.f32 %v362_v18, 0.0  ;;  %v365_v21 = vmax.f32 %v363_v19, 0.0  ;;  %v957_v18 = vld [vmem:[%s1144_s1 + $0x4] sm:$0x3] }
  0x93   : > { %372 = vrot.lane.b32.xlu1 %v364_v20, %s990_s16  ;;  %v369_v22 = vcombine.high %v365_v21, %v365_v21  ;;  %v368_v23 = vcombine.high %v364_v20, %v364_v20  ;;  %v461_v24 = vpack.c.bf16 %v365_v21, %v365_v21  ;;  %v459_v25 = vpack.c.bf16 %v364_v20, %v364_v20 }
  0x95   : > { %378 = vrot.lane.b32.xlu0 %v369_v22, %s990_s16  ;;  %v462_v26 = vpack.c.bf16 %v369_v22, %v369_v22  ;;  %v460_v27 = vpack.c.bf16 %v368_v23, %v368_v23  ;;  %v475_v28 = vsel %vm467_vm0, %v461_v24, 0  ;;  %v469_v29 = vsel %vm467_vm0, %v459_v25, 0 }
  0x97   : > { %951 = vmatprep.subr.msk.bf16.mxu1 %vm467_vm0, %v462_v26  ;;  %374 = vrot.lane.b32.xlu1 %v368_v23, %s990_s16 }
  0x98   : > { %949 = vmatprep.subr.msk.bf16.mxu0 %vm467_vm0, %v460_v27  ;;  %536 = vmatpush1.bf16.msra.mxu1 %v475_v28 }
  0x99   : > { %495 = vmatpush1.bf16.msra.mxu0 %v469_v29  ;;  %413 = vrot.lane.b32.xlu0 %v364_v20, %s991_s17 }
  0x9b   : > { %376 = vrot.lane.b32.xlu1 %v365_v21, %s990_s16  ;;  %952 = vmatmul.mubr.msk.bf16.vlgmr.msra.gmra.mxu1 %vm463_vm1, %v948_v30  ;;  %s325_s16 = scalar_lea.vmem %s1150_s7, %s946_s13 }
  0x9c   : > { %950 = vmatmul.mubr.msk.bf16.vlgmr.msra.gmra.mxu0 %vm463_vm1, %v948_v30  ;;  %650 = vmatprep.mubr.bf16.mxu1 %v988_v1 }
  0x9d   : > { %417 = vrot.lane.b32.xlu0 %v365_v21, %s991_s17  ;;  %609 = vmatprep.mubr.bf16.mxu0 %v988_v1 }
  0x9f   : > { %415 = vrot.lane.b32.xlu1 %v368_v23, %s991_s17 }
  0xa3   : > { %419 = vrot.lane.b32.xlu1 %v369_v22, %s991_s17 }
 0x105   : > { %v373_v35 = vpop.permute.xlu1 %372 }
 0x107   : > { %v379_v37 = vpop.permute.xlu0 %378 }
 0x108   : > { %v386_v41 = vsel %vm382_vm2, %v379_v37, %v373_v35 }
 0x109   : > { %v409_v42 = vmul.f32 %v392_v36, %v386_v41  ;;  %v375_v43 = vpop.permute.xlu1 %374 }
 0x10a   : > { %v385_v44 = vsel %vm382_vm2, %v373_v35, %v375_v43  ;;  %v992_v35 = vmov 1983009808  }
 0x10b   : > { %v453_v45 = vpack.c.bf16 %v409_v42, %v409_v42  ;;  %v410_v46 = vmul.f32 %v396_v38, %v385_v44  ;;  %v414_v47 = vpop.permute.xlu0 %413  ;;  %v777_v36 = vunpack.c.l.s4 %v992_v35 }
 0x10d   : > { %v454_v51 = vpack.c.bf16 %v410_v46, %v410_v46  ;;  %v377_v52 = vpop.permute.xlu1 %376  ;;  %v566_v58 = vsel %vm467_vm0, %v453_v45, 0  ;;  %v778_v44 = vunpack.c.0.s8 %v777_v36 }
 0x10e   : > { %v383_v53 = vsel %vm382_vm2, %v377_v52, %v379_v37  ;;  %v384_v54 = vsel %vm382_vm2, %v375_v43, %v377_v52 }
 0x10f   : > { %v411_v56 = vmul.f32 %v400_v48, %v384_v54  ;;  %v412_v57 = vmul.f32 %v404_v49, %v383_v53  ;;  %953 = vmatprep.subr.msk.bf16.mxu0 %vm467_vm0, %v454_v51  ;;  %v418_v63 = vpop.permute.xlu0 %417 }
 0x110   : > { %592 = vmatpush1.bf16.msra.mxu0 %v566_v58 }
 0x111   : > { %v455_v61 = vpack.c.bf16 %v411_v56, %v411_v56  ;;  %v456_v62 = vpack.c.bf16 %v412_v57, %v412_v57  ;;  %v416_v0 = vpop.permute.xlu1 %415 }
 0x112   : > { %v423_v2 = vsel %vm421_vm3, %v416_v0, %v418_v63  ;;  %v424_v3 = vsel %vm421_vm3, %v414_v47, %v416_v0 }
 0x113   : > { %v448_v5 = vmul.f32 %v431_v55, %v424_v3  ;;  %v449_v6 = vmul.f32 %v435_v59, %v423_v2  ;;  %954 = vmatmul.mubr.msk.bf16.vlgmr.msra.gmra.mxu0 %vm463_vm1, %v452_v60  ;;  %955 = vmatprep.subr.msk.bf16.mxu1 %vm467_vm0, %v456_v62  ;;  %v572_v8 = vsel %vm467_vm0, %v455_v61, 0  ;;  %v781_v55 = vsub.s32 %v778_v44, %v1061_v7 }
 0x114   : > { %633 = vmatpush1.bf16.msra.mxu1 %v572_v8  ;;  %712 = vmatprep.mubr.bf16.mxu0 %v988_v1 }
 0x115   : > { %v661_v10 = vpack.c.bf16 %v448_v5, %v448_v5  ;;  %v662_v11 = vpack.c.bf16 %v449_v6, %v449_v6  ;;  %v420_v12 = vpop.permute.xlu1 %419 }
 0x116   : > { %v422_v13 = vsel %vm421_vm3, %v418_v63, %v420_v12  ;;  %v425_v14 = vsel %vm421_vm3, %v420_v12, %v414_v47 }
 0x117   : > { %v450_v15 = vmul.f32 %v439_v4, %v422_v13  ;;  %v451_v16 = vmul.f32 %v443_v9, %v425_v14  ;;  %956 = vmatmul.mubr.msk.bf16.vlgmr.msra.gmra.mxu1 %vm463_vm1, %v452_v60  ;;  %958 = vmatprep.subr.msk.bf16.mxu0 %vm467_vm0, %v662_v11  ;;  %v669_v17 = vsel %vm467_vm0, %v661_v10, 0 }
 0x118   : > { %695 = vmatpush1.bf16.msra.mxu0 %v669_v17  ;;  %753 = vmatprep.mubr.bf16.mxu1 %v988_v1 }
 0x119   : > { %v663_v19 = vpack.c.bf16 %v450_v15, %v450_v15  ;;  %v664_v20 = vpack.c.bf16 %v451_v16, %v451_v16 }
 0x11b   : > { %959 = vmatmul.mubr.msk.bf16.vlgmr.msra.gmra.mxu0 %vm463_vm1, %v957_v18  ;;  %960 = vmatprep.subr.msk.bf16.mxu1 %vm467_vm0, %v664_v20  ;;  %v675_v21 = vsel %vm467_vm0, %v663_v19, 0 }
 0x11c   : > { %736 = vmatpush1.bf16.msra.mxu1 %v675_v21 }
 0x11f   : > { %961 = vmatmul.mubr.msk.bf16.vlgmr.msra.gmra.mxu1 %vm463_vm1, %v957_v18 }
 0x15b   : > { %v555_v22 = vpop.f32.mrf.mxu1 }
 0x15c   : > { %v514_v23 = vpop.f32.mrf.mxu0 }
 0x15d   : > { %v557_v24 = vpop.f32.mrf.mxu1 }
 0x15e   : > { %v516_v25 = vpop.f32.mrf.mxu0 }
 0x15f   : > { %v559_v26 = vpop.f32.mrf.mxu1 }
 0x160   : > { %v518_v27 = vpop.f32.mrf.mxu0 }
 0x161   : > { %v560_v28 = vpop.f32.mrf.mxu1 }
 0x162   : > { %v519_v29 = vpop.f32.mrf.mxu0 }
 0x1d3   : > { %v611_v1 = vpop.f32.mrf.mxu0 }
 0x1d4   : > { %v612_v37 = vadd.f32 %v611_v1, %v514_v23 }
 0x1d5   : > { %v613_v30 = vpop.f32.mrf.mxu0 }
 0x1d6   : > { %v614_v40 = vadd.f32 %v613_v30, %v516_v25 }
 0x1d7   : > { %v615_v31 = vpop.f32.mrf.mxu0  ;;  %v652_v32 = vpop.f32.mrf.mxu1 }
 0x1d8   : > { %v653_v45 = vadd.f32 %v652_v32, %v555_v22 }
 0x1d9   : > { %v616_v33 = vpop.f32.mrf.mxu0  ;;  %v654_v34 = vpop.f32.mrf.mxu1 }
 0x1da   : > { %v655_v47 = vadd.f32 %v654_v34, %v557_v24 }
 0x1db   : > { %v656_v38 = vpop.f32.mrf.mxu1  ;;  %v714_v39 = vpop.f32.mrf.mxu0 }
 0x1dc   : > { %v762_v41 = vadd.f32 %v714_v39, %v612_v37 }
 0x1dd   : > { %v657_v42 = vpop.f32.mrf.mxu1  ;;  %v716_v43 = vpop.f32.mrf.mxu0 }
 0x1de   : > { %v763_v46 = vadd.f32 %v716_v43, %v614_v40  ;;  %v805_v48 = vmul.f32 %v762_v41, %v762_v41  ;;  %v794_v51 = vsel %vm793_vm4, %v762_v41, 0.0 }
 0x1df   : > { %v718_v49 = vpop.f32.mrf.mxu0  ;;  %v755_v50 = vpop.f32.mrf.mxu1 }
 0x1e0   : > { %v795_v52 = vsel %vm793_vm4, %v763_v46, 0.0  ;;  %v806_v53 = vmul.f32 %v763_v46, %v763_v46  ;;  %v764_v54 = vadd.f32 %v755_v50, %v653_v45  ;;  %v962_v59 = vpack.c.bf16 %v763_v46, %v762_v41 }
 0x1e1   : > { %v719_v56 = vpop.f32.mrf.mxu0  ;;  %v757_v57 = vpop.f32.mrf.mxu1  ;;  %v796_v58 = vadd.f32 %v795_v52, %v794_v51  ;;  %v809_v2 = vsel %vm793_vm4, %v805_v48, 0.0 }
 0x1e2   : > { %v807_v60 = vmul.f32 %v764_v54, %v764_v54  ;;  %v765_v61 = vadd.f32 %v757_v57, %v655_v47  ;;  %v797_v62 = vsel %vm793_vm4, %v764_v54, 0.0  ;;  %v810_v3 = vsel %vm793_vm4, %v806_v53, 0.0 }
 0x1e3   : > { %v759_v63 = vpop.f32.mrf.mxu1  ;;  %v798_v0 = vadd.f32 %v797_v62, %v796_v58  ;;  %v811_v6 = vadd.f32 %v810_v3, %v809_v2  ;;  %v782_v11 = vrot.slane %v962_v59, %v781_v55 }
 0x1e4   : > { %v963_v4 = vpack.c.bf16 %v765_v61, %v764_v54  ;;  %v799_v5 = vsel %vm793_vm4, %v765_v61, 0.0  ;;  %v808_v7 = vmul.f32 %v765_v61, %v765_v61  ;;  %v812_v10 = vsel %vm793_vm4, %v807_v60, 0.0 }
 0x1e5   : > { %v760_v8 = vpop.f32.mrf.mxu1  ;;  %v800_v9 = vadd.f32 %v799_v5, %v798_v0  ;;  %v813_v13 = vadd.f32 %v812_v10, %v811_v6 }
 0x1e6   : > { %v789_v12 = vrot.slane %v963_v4, %v781_v55  ;;  %v814_v14 = vsel %vm793_vm4, %v808_v7, 0.0 }
 0x1e7   : > { %801 = vadd.xlane.f32.xlu0 %v800_v9  ;;  %v815_v16 = vadd.f32 %v814_v14, %v813_v13 }
 0x1e8   : > { %v790_v15 = vcombine.low %v782_v11, %v789_v12 }
 0x1e9   : > { %816 = vadd.xlane.f32.xlu1 %v815_v16 }
 0x1ea   : > { %792 = vst [vmem:[%s320_s10] sm:$0xff] %v790_v15 }
 0x270   : > { %v802_v17 = vpop.xlane.xlu0 %801 }
 0x271   : > { %804 = vst.msk [vmem:[%s325_s16] sm:$0xf] %vm803_vm5, %v802_v17 }
 0x272   : > { %v817_v18 = vpop.xlane.xlu1 %816 }
 0x273   : > { %818 = vst.msk [vmem:[%s329_s18] sm:$0xf] %vm803_vm5, %v817_v18 }
 0x274 PF: > { %s19_s27 = sadd.s32 1, %s986_s27  }
 0x275   : > { %p16_p5 = scmp.ge.s32.totalorder %s19_s27, 4  }
 0x277   :  { %18 = sbr.rel (!%p16_p5) target bundleno = 1 (0x1), region = 100 }

// kernel: small_block_forward.8
= control target key start
LH: loop header
LB: loop body
LE: loop exit
PB: predicated region body
PF: predicated region fallthrough
CT: control target
= control target key end

     0   :  { %s762_s21 = smov 0   ;;  %s764_s22 = smov 0   ;;  %s839_s0 = inlined_call_operand.vmem [shape: bf16[4,1024], index: 0, kind: input, shape index: {}]   ;;  %s840_s1 = inlined_call_operand.vmem [shape: bf16[16,4], index: 1, kind: input, shape index: {}]   ;;  %s841_s2 = inlined_call_operand.vmem [shape: f32[4,1], index: 2, kind: input, shape index: {}]   ;;  %s842_s3 = inlined_call_operand.vmem [shape: f32[4,1], index: 3, kind: input, shape index: {}]   ;;  %s843_s4 = inlined_call_operand.vmem [shape: bf16[16,1024], index: 4, kind: output, shape index: {0}]   ;;  %s844_s5 = inlined_call_operand.vmem [shape: f32[2,16,1], index: 5, kind: output, shape index: {1}]   ;;  %s845_s6 = inlined_call_operand.vmem [shape: f32[2,16,1], index: 6, kind: output, shape index: {2}]  }
   0x1   :  { %s766_s23 = smov 0  }
   0x2 LB: > { %s775_s24 = sadd.s32 4294967295, %s723_s23   ;;  %s777_s25 = sadd.s32 1, %s723_s23   ;;  %s723_s23 = sphi %s766_s23, %s849_s23   ;;  %s719_s22 = sphi %s764_s22, %s848_s22   ;;  %s715_s21 = sphi %s762_s21, %s847_s21  }
   0x3   : > { %s110_s26 = ssub.s32 %s723_s23, %s777_s25  ;;  %s113_s27 = sadd.s32 1, %s719_s22 }
   0x4   : > { %p111_p0 = scmp.eq.s32.totalorder %s110_s26, 0  ;;  %p123_p1 = scmp.ne.s32.totalorder %s719_s22, %s715_s21 }
   0x5   : > { %p124_p2 = scmp.eq.s32.totalorder %s775_s24, 1  ;;  %p644_p3 = scmp.ge.s32.totalorder %s723_s23, 1 }
   0x6   : > { %s785_s28 = scalar_select %p111_p0, %s719_s22, %s113_s27  }
   0x7   : > { %p787_p4 = por %p124_p2, %p123_p1  ;;  %p218_p5 = scmp.lt.s32.totalorder %s723_s23, 3 }
   0x9   : > { %p219_p6 = pnand %p644_p3, %p218_p5 }
   0xa   : > { %s646_s10 = sshll.u32 (!%p219_p6), %s775_s24, 2  ;;  %s240_s17 = sand.u32 (!%p219_p6), 1, %s715_s21  }
   0xb   : > { %222 = sbr.rel (%p219_p6) target bundleno = 509 (0x1fd), region = 36  ;;  %p258_p7 = scmp.lt.s32.totalorder (!%p219_p6), %s646_s10, 7 }
   0xc   : > { %s645_s18 = sshll.u32 (!%p219_p6), %s240_s17, 5  ;;  %p264_p8 = scmp.lt.s32.totalorder (!%p219_p6), %s775_s24, 1 }
   0xd   : > { %s805_s19 = scalar_lea.vmem (!%p219_p6), [#allocation2], %s645_s18 }
  0x10   : > { %v278_v0 = vld [vmem:[%s841_s2] sm:$0xf]  ;;  %v725_v1 = vmov 0   ;;  %s851_s10 = smov (!%p258_p7, %s646_s10), 7  ;;  %v726_v3 = vmov 839922192   ;;  %v286_v5 = vlaneseq }
  0x11   : > { %699 = vset.pattern.permute.xlu0 %v725_v1  ;;  %376 = vmatprep.mubr.bf16.mxu0 %v725_v1  ;;  %v293_v2 = vld [vmem:[%s842_s3] sm:$0xf]  ;;  %v284_v4 = vunpack.c.l.s4 %v726_v3  ;;  %s647_s11 = sshll.u32 %s851_s10, 1  ;;  %vm331_vm0 = vcmask 1041408   ;;  %vm327_vm1 = vcmask 31744   ;;  %vm468_vm2 = vcmask 7168  }
  0x12   : > { %281 = vperm.xlu0 %699, %v278_v0   ;;  %419 = vmatprep.mubr.bf16.mxu1 %v725_v1  ;;  %v287_v7 = vshrl.u32 %v286_v5, 7  ;;  %s261_s14 = scalar_lea.vmem %s839_s0, %s647_s11  ;;  %v700_v30 = vld [vmem:[%s840_s1] sm:$0xff]   ;;  %s672_s9 = sshll.u32 (%p787_p4), %s775_s24, 4 }
  0x13   : > { %v285_v6 = vunpack.c.0.s8 %v284_v4  ;;  %v275_v9 = vld [vmem:[%s261_s14] sm:$0xff]  ;;  %s265_s20 = scalar_select %p264_p8, %s775_s24, 1 }
  0x14   : > { %v276_v11 = vunpack.c.l.bf16 %v275_v9  ;;  %v277_v12 = vunpack.c.h.bf16 %v275_v9  ;;  %s510_s12 = scalar_lea.vmem (%p787_p4), %s843_s4, %s672_s9 }
  0x15   : > { %v288_v8 = vsub.s32 %v285_v6, %v287_v7  ;;  %s666_s21 = sshll.u32 %s265_s20, 4 }
  0x16   : > { %296 = vperm.xlu0 %699, %v293_v2   ;;  %s268_s27 = scalar_lea.vmem %s844_s5, %s666_s21  ;;  %s273_s8 = scalar_lea.vmem %s845_s6, %s666_s21 }
  0x8d   : > { %v282_v10 = vpop.permute.xlu0 %281 }
  0x8e   : > { %v289_v13 = vrot.slane %v282_v10, %v288_v8 }
  0x90   : > { %v291_v15 = vmul.f32 %v289_v13, %v276_v11  ;;  %v292_v16 = vmul.f32 %v289_v13, %v277_v12 }
  0x91   : > { %v297_v14 = vpop.permute.xlu0 %296 }
  0x92   : > { %v304_v17 = vrot.slane %v297_v14, %v288_v8 }
  0x94   : > { %v306_v18 = vadd.f32 %v304_v17, %v291_v15  ;;  %v307_v19 = vadd.f32 %v304_v17, %v292_v16 }
  0x96   : > { %v308_v20 = vmax.f32 %v306_v18, 0.0  ;;  %v309_v21 = vmax.f32 %v307_v19, 0.0 }
  0x98   : > { %v314_v22 = vcombine.high %v308_v20, %v308_v20  ;;  %v315_v23 = vcombine.high %v309_v21, %v309_v21  ;;  %v318_v24 = vpack.c.bf16 %v308_v20, %v308_v20  ;;  %v320_v25 = vpack.c.bf16 %v309_v21, %v309_v21 }
  0x9a   : > { %v319_v26 = vpack.c.bf16 %v314_v22, %v314_v22  ;;  %v321_v27 = vpack.c.bf16 %v315_v23, %v315_v23  ;;  %v333_v28 = vsel %vm331_vm0, %v318_v24, 0  ;;  %v339_v29 = vsel %vm331_vm0, %v320_v25, 0 }
  0x9c   : > { %653 = vmatprep.subr.msk.bf16.mxu0 %vm331_vm0, %v319_v26  ;;  %655 = vmatprep.subr.msk.bf16.mxu1 %vm331_vm0, %v321_v27 }
  0x9d   : > { %359 = vmatpush1.bf16.msra.mxu0 %v333_v28  ;;  %402 = vmatpush1.bf16.msra.mxu1 %v339_v29 }
  0xa0   : > { %654 = vmatmul.mubr.msk.bf16.vlgmr.msra.gmra.mxu0 %vm327_vm1, %v700_v30  ;;  %656 = vmatmul.mubr.msk.bf16.vlgmr.msra.gmra.mxu1 %vm327_vm1, %v700_v30 }
 0x160   : > { %v378_v31 = vpop.f32.mrf.mxu0  ;;  %v421_v32 = vpop.f32.mrf.mxu1 }
 0x161   : > { %v471_v33 = vmul.f32 %v378_v31, %v378_v31  ;;  %v473_v40 = vmul.f32 %v421_v32, %v421_v32 }
 0x162   : > { %v380_v34 = vpop.f32.mrf.mxu0  ;;  %v423_v35 = vpop.f32.mrf.mxu1 }
 0x163   : > { %v668_v36 = vpack.c.bf16 %v380_v34, %v378_v31  ;;  %v458_v37 = vadd.f32 %v380_v34, %v378_v31  ;;  %v472_v38 = vmul.f32 %v380_v34, %v380_v34  ;;  %v669_v39 = vpack.c.bf16 %v423_v35, %v421_v32 }
 0x164   : > { %v382_v41 = vpop.f32.mrf.mxu0  ;;  %v425_v42 = vpop.f32.mrf.mxu1  ;;  %v474_v53 = vmul.f32 %v423_v35, %v423_v35 }
 0x165   : > { %454 = vst [vmem:[%s805_s19] sm:$0xff] %v668_v36  ;;  %455 = vst [vmem:[%s805_s19 + $0x8] sm:$0xff] %v669_v39  ;;  %v459_v43 = vadd.f32 %v458_v37, %v421_v32  ;;  %v479_v44 = vadd.f32 %v472_v38, %v471_v33  ;;  %v475_v45 = vmul.f32 %v382_v41, %v382_v41 }
 0x166   : > { %v384_v46 = vpop.f32.mrf.mxu0  ;;  %v427_v47 = vpop.f32.mrf.mxu1  ;;  %v477_v57 = vmul.f32 %v425_v42, %v425_v42 }
 0x167   : > { %v670_v48 = vpack.c.bf16 %v384_v46, %v382_v41  ;;  %v463_v49 = vadd.f32 %v384_v46, %v382_v41  ;;  %v476_v50 = vmul.f32 %v384_v46, %v384_v46  ;;  %v671_v51 = vpack.c.bf16 %v427_v47, %v425_v42 }
 0x168   : > { %v460_v52 = vadd.f32 %v459_v43, %v423_v35  ;;  %v480_v54 = vadd.f32 %v479_v44, %v473_v40  ;;  %v478_v61 = vmul.f32 %v427_v47, %v427_v47 }
 0x169   : > { %456 = vst [vmem:[%s805_s19 + $0x10] sm:$0xff] %v670_v48  ;;  %v484_v55 = vadd.f32 %v476_v50, %v475_v45  ;;  %457 = vst [vmem:[%s805_s19 + $0x18] sm:$0xff] %v671_v51  ;;  %v464_v56 = vadd.f32 %v463_v49, %v425_v42 }
 0x16a   : > { %461 = vadd.xlane.f32.xlu1 %v460_v52  ;;  %v481_v58 = vadd.f32 %v480_v54, %v474_v53 }
 0x16b   : > { %v465_v59 = vadd.f32 %v464_v56, %v427_v47  ;;  %v485_v60 = vadd.f32 %v484_v55, %v477_v57 }
 0x16c   : > { %482 = vadd.xlane.f32.xlu0 %v481_v58  ;;  %v523_v3 = vld [vmem:[%s805_s19] sm:$0xff] (%p787_p4)  ;;  %v525_v4 = vld [vmem:[%s805_s19 + $0x8] sm:$0xff] (%p787_p4) }
 0x16d   : > { %v486_v62 = vadd.f32 %v485_v60, %v478_v61  ;;  %524 = vst [vmem:[%s510_s12] sm:$0xff] (%p787_p4), %v523_v3  ;;  %526 = vst [vmem:[%s510_s12 + $0x8] sm:$0xff] (%p787_p4), %v525_v4 }
 0x16e   : > { %466 = vadd.xlane.f32.xlu1 %v465_v59 }
 0x170   : > { %v527_v5 = vld [vmem:[%s805_s19 + $0x10] sm:$0xff] (%p787_p4)  ;;  %v529_v6 = vld [vmem:[%s805_s19 + $0x18] sm:$0xff] (%p787_p4) }
 0x171   : > { %528 = vst [vmem:[%s510_s12 + $0x20] sm:$0xff] (%p787_p4), %v527_v5  ;;  %530 = vst [vmem:[%s510_s12 + $0x28] sm:$0xff] (%p787_p4), %v529_v6 }
 0x172   : > { %487 = vadd.xlane.f32.xlu1 %v486_v62 }
 0x1f3   : > { %v462_v63 = vpop.xlane.xlu1 %461 }
 0x1f4   : > { %469 = vst.msk [vmem:[%s268_s27] sm:$0xff] %vm468_vm2, %v462_v63 }
 0x1f5   : > { %v483_v0 = vpop.xlane.xlu0 %482 }
 0x1f6   : > { %489 = vst.msk [vmem:[%s273_s8] sm:$0xff] %vm468_vm2, %v483_v0 }
 0x1f7   : > { %v467_v1 = vpop.xlane.xlu1 %466 }
 0x1f8   : > { %470 = vst.msk [vmem:[%s268_s27 + $0x8] sm:$0xff] %vm468_vm2, %v467_v1  ;;  %507 = sbr.rel (!%p787_p4) target bundleno = 509 (0x1fd), region = 40 }
 0x1fb   : > { %v488_v2 = vpop.xlane.xlu1 %487 }
 0x1fc   : > { %490 = vst.msk [vmem:[%s273_s8 + $0x8] sm:$0xff] %vm468_vm2, %v488_v2 }
 0x1fd PF: > { %p14_p9 = scmp.ge.s32.totalorder %s777_s25, 4   ;;  %s847_s21 = smov %s719_s22 }
 0x1fe   : > { %s848_s22 = smov %s785_s28  ;;  %s849_s23 = smov %s777_s25 }
 0x1ff   :  { %16 = sbr.rel (!%p14_p9) target bundleno = 2 (0x2), region = 113 }

// kernel: small_block_forward.9
= control target key start
LH: loop header
LB: loop body
LE: loop exit
PB: predicated region body
PF: predicated region fallthrough
CT: control target
= control target key end

     0   :  { %s447_s12 = smov 0   ;;  %s449_s13 = smov 0   ;;  %s537_s0 = inlined_call_operand.vmem [shape: bf16[16,1024], index: 0, kind: input, shape index: {}]   ;;  %s538_s1 = inlined_call_operand.vmem [shape: f32[16,1], index: 1, kind: input, shape index: {}]   ;;  %s539_s2 = inlined_call_operand.vmem [shape: f32[16,1], index: 2, kind: input, shape index: {}]   ;;  %s540_s3 = inlined_call_operand.vmem [shape: f32[16,1024], index: 3, kind: output, shape index: {}]  }
   0x1   :  { %s451_s14 = smov 0  }
   0x2 LB: > { %s358_s15 = sadd.s32 4294967295, %s424_s14   ;;  %s464_s16 = sadd.s32 1, %s424_s14   ;;  %s424_s14 = sphi %s451_s14, %s544_s14   ;;  %s420_s13 = sphi %s449_s13, %s543_s13   ;;  %s416_s12 = sphi %s447_s12, %s542_s12  }
   0x3   : > { %s17_s17 = ssub.s32 %s424_s14, %s464_s16  ;;  %s20_s18 = sadd.s32 1, %s420_s13 }
   0x4   : > { %p18_p0 = scmp.eq.s32.totalorder %s17_s17, 0  ;;  %p27_p1 = scmp.ne.s32.totalorder %s420_s13, %s416_s12 }
   0x5   : > { %p28_p2 = scmp.eq.s32.totalorder %s424_s14, 0  ;;  %p99_p3 = scmp.eq.s32.totalorder %s358_s15, 1 }
   0x6   : > { %s475_s19 = scalar_select %p18_p0, %s420_s13, %s20_s18  }
   0x7   : > { %p29_p4 = por %p28_p2, %p27_p1  ;;  %p477_p5 = por %p99_p3, %p27_p1 }
   0x8   : > { %p361_p6 = scmp.ge.s32.totalorder %s424_s14, 2 }
   0xa   : > { %127 = sbr.rel (%p361_p6) target bundleno = 21 (0x15), region = 24 }
   0xf   : > { %130 = sbr.rel (!%p29_p4) target bundleno = 21 (0x15), region = 28  ;;  %s132_s21 = sand.u32 (%p29_p4), 1, %s420_s13  }
  0x10   : > { %s373_s22 = sshll.u32 (%p29_p4), %s424_s14, 4  ;;  %s362_s23 = sshll.u32 (%p29_p4), %s132_s21, 5 }
  0x11   : > { %s137_s26 = scalar_lea.vmem (%p29_p4), %s537_s0, %s373_s22  ;;  %s134_s27 = scalar_lea.vmem (%p29_p4), [#allocation2], %s362_s23 }
  0x12   : > { %v150_v0 = vld [vmem:[%s137_s26] sm:$0xff] (%p29_p4)  ;;  %v152_v1 = vld [vmem:[%s137_s26 + $0x8] sm:$0xff] (%p29_p4) }
  0x13   : > { %v154_v2 = vld [vmem:[%s137_s26 + $0x20] sm:$0xff] (%p29_p4)  ;;  %151 = vst [vmem:[%s134_s27] sm:$0xff] (%p29_p4), %v150_v0  ;;  %153 = vst [vmem:[%s134_s27 + $0x8] sm:$0xff] (%p29_p4), %v152_v1  ;;  %v156_v3 = vld [vmem:[%s137_s26 + $0x28] sm:$0xff] (%p29_p4) }
  0x14   : > { %155 = vst [vmem:[%s134_s27 + $0x10] sm:$0xff] %v154_v2  ;;  %157 = vst [vmem:[%s134_s27 + $0x18] sm:$0xff] %v156_v3 }
  0x15 PF: > { %p365_p7 = scmp.ge.s32.totalorder %s424_s14, 1  ;;  %p162_p8 = scmp.lt.s32.totalorder %s424_s14, 3 }
  0x17   : > { %p163_p9 = pnand %p365_p7, %p162_p8 }
  0x18   : > { %s169_s9 = sand.u32 (!%p163_p9), 1, %s416_s12  }
  0x19   : > { %166 = sbr.rel (%p163_p9) target bundleno = 177 (0xb1), region = 51  ;;  %s366_s10 = sshll.u32 (!%p163_p9), %s169_s9, 5 }
  0x1a   : > { %s171_s11 = scalar_lea.vmem (!%p163_p9), [#allocation2], %s366_s10  ;;  %s367_s17 = sshll.u32 (!%p163_p9), %s169_s9, 6 }
  0x1b   : > { %s502_s12 = scalar_lea.vmem (!%p163_p9), [#allocation3], %s367_s17 }
  0x1e   : > { %v225_v4 = vld [vmem:[%s539_s2] sm:$0xff]  ;;  %v426_v6 = vmov 0   ;;  %v226_v7 = vld [vmem:[%s539_s2 + $0x8] sm:$0xff]  ;;  %v195_v15 = vld [vmem:[%s171_s11 + $0x10] sm:$0xff]  ;;  %s374_s18 = sshll.u32 (%p477_p5), %s358_s15, 5 }
  0x1f   : > { %v205_v5 = vld [vmem:[%s538_s1] sm:$0xff]  ;;  %401 = vset.pattern.permute.xlu1 %v426_v6  ;;  %400 = vset.pattern.permute.xlu0 %v426_v6  ;;  %v206_v8 = vld [vmem:[%s538_s1 + $0x8] sm:$0xff]  ;;  %v196_v16 = vld [vmem:[%s171_s11 + $0x18] sm:$0xff]  ;;  %v201_v23 = vunpack.c.l.bf16 %v195_v15  ;;  %v202_v24 = vunpack.c.h.bf16 %v195_v15  ;;  %s270_s23 = scalar_lea.vmem (%p477_p5), %s540_s3, %s374_s18 }
  0x20   : > { %229 = vperm.xlu1 %401, %v225_v4   ;;  %209 = vperm.xlu0 %400, %v205_v5   ;;  %v193_v9 = vld [vmem:[%s171_s11] sm:$0xff]  ;;  %v194_v10 = vld [vmem:[%s171_s11 + $0x8] sm:$0xff]  ;;  %v203_v25 = vunpack.c.l.bf16 %v196_v16  ;;  %v204_v26 = vunpack.c.h.bf16 %v196_v16 }
  0x21   : > { %v197_v11 = vunpack.c.l.bf16 %v193_v9  ;;  %v198_v12 = vunpack.c.h.bf16 %v193_v9  ;;  %v199_v13 = vunpack.c.l.bf16 %v194_v10  ;;  %v200_v14 = vunpack.c.h.bf16 %v194_v10 }
  0x24   : > { %234 = vperm.xlu1 %401, %v226_v7   ;;  %214 = vperm.xlu0 %400, %v206_v8  }
  0x9b   : > { %v210_v17 = vpop.permute.xlu0 %209  ;;  %v230_v18 = vpop.permute.xlu1 %229 }
  0x9c   : > { %v217_v19 = vmul.f32 %v210_v17, %v197_v11  ;;  %v218_v20 = vmul.f32 %v210_v17, %v198_v12  ;;  %v219_v21 = vmul.f32 %v210_v17, %v199_v13  ;;  %v220_v22 = vmul.f32 %v210_v17, %v200_v14 }
  0x9e   : > { %v237_v27 = vadd.f32 %v230_v18, %v217_v19  ;;  %v238_v28 = vadd.f32 %v230_v18, %v218_v20  ;;  %v239_v29 = vadd.f32 %v230_v18, %v219_v21  ;;  %v240_v30 = vadd.f32 %v230_v18, %v220_v22 }
  0x9f   : > { %v215_v31 = vpop.permute.xlu0 %214  ;;  %v235_v40 = vpop.permute.xlu1 %234 }
  0xa0   : > { %v245_v32 = vmax.f32 %v237_v27, 0.0  ;;  %v246_v33 = vmax.f32 %v238_v28, 0.0  ;;  %v247_v34 = vmax.f32 %v239_v29, 0.0  ;;  %v248_v35 = vmax.f32 %v240_v30, 0.0 }
  0xa1   : > { %v221_v36 = vmul.f32 %v215_v31, %v201_v23  ;;  %v222_v37 = vmul.f32 %v215_v31, %v202_v24  ;;  %v223_v38 = vmul.f32 %v215_v31, %v203_v25  ;;  %v224_v39 = vmul.f32 %v215_v31, %v204_v26 }
  0xa2   : > { %253 = vst [vmem:[%s502_s12] sm:$0xff] %v245_v32  ;;  %254 = vst [vmem:[%s502_s12 + $0x8] sm:$0xff] %v246_v33 }
  0xa3   : > { %255 = vst [vmem:[%s502_s12 + $0x10] sm:$0xff] %v247_v34  ;;  %256 = vst [vmem:[%s502_s12 + $0x18] sm:$0xff] %v248_v35  ;;  %v241_v41 = vadd.f32 %v235_v40, %v221_v36  ;;  %v242_v42 = vadd.f32 %v235_v40, %v222_v37  ;;  %v243_v43 = vadd.f32 %v235_v40, %v223_v38 }
  0xa4   : > { %v244_v44 = vadd.f32 %v235_v40, %v224_v39  ;;  %267 = sbr.rel (!%p477_p5) target bundleno = 177 (0xb1), region = 59 }
  0xa5   : > { %v249_v45 = vmax.f32 %v241_v41, 0.0  ;;  %v250_v46 = vmax.f32 %v242_v42, 0.0  ;;  %v251_v47 = vmax.f32 %v243_v43, 0.0 }
  0xa6   : > { %v252_v48 = vmax.f32 %v244_v44, 0.0 }
  0xa7   : > { %257 = vst [vmem:[%s502_s12 + $0x20] sm:$0xff] %v249_v45  ;;  %258 = vst [vmem:[%s502_s12 + $0x28] sm:$0xff] %v250_v46 }
  0xa8   : > { %259 = vst [vmem:[%s502_s12 + $0x30] sm:$0xff] %v251_v47  ;;  %260 = vst [vmem:[%s502_s12 + $0x38] sm:$0xff] %v252_v48 }
  0xa9   : > { %v283_v49 = vld [vmem:[%s502_s12] sm:$0xff]  ;;  %v285_v50 = vld [vmem:[%s502_s12 + $0x8] sm:$0xff] }
  0xaa   : > { %v287_v51 = vld [vmem:[%s502_s12 + $0x10] sm:$0xff]  ;;  %v289_v52 = vld [vmem:[%s502_s12 + $0x18] sm:$0xff]  ;;  %284 = vst [vmem:[%s270_s23] sm:$0xff] %v283_v49  ;;  %286 = vst [vmem:[%s270_s23 + $0x8] sm:$0xff] %v285_v50 }
  0xab   : > { %288 = vst [vmem:[%s270_s23 + $0x10] sm:$0xff] %v287_v51  ;;  %290 = vst [vmem:[%s270_s23 + $0x18] sm:$0xff] %v289_v52 }
  0xae   : > { %v291_v53 = vld [vmem:[%s502_s12 + $0x20] sm:$0xff]  ;;  %v293_v54 = vld [vmem:[%s502_s12 + $0x28] sm:$0xff] }
  0xaf   : > { %292 = vst [vmem:[%s270_s23 + $0x40] sm:$0xff] %v291_v53  ;;  %294 = vst [vmem:[%s270_s23 + $0x48] sm:$0xff] %v293_v54  ;;  %v295_v55 = vld [vmem:[%s502_s12 + $0x30] sm:$0xff]  ;;  %v297_v56 = vld [vmem:[%s502_s12 + $0x38] sm:$0xff] }
  0xb0   : > { %296 = vst [vmem:[%s270_s23 + $0x50] sm:$0xff] %v295_v55  ;;  %298 = vst [vmem:[%s270_s23 + $0x58] sm:$0xff] %v297_v56 }
  0xb1 PF: > { %p10_p10 = scmp.ge.s32.totalorder %s464_s16, 4   ;;  %s542_s12 = smov %s420_s13 }
  0xb2   : > { %s543_s13 = smov %s475_s19  ;;  %s544_s14 = smov %s464_s16 }
  0xb3   :  { %12 = sbr.rel (!%p10_p10) target bundleno = 2 (0x2), region = 113 }

</bundles_post_ra>
